<compile_context>
chip_gen: v7x
topology: tpu7x:2x2x1
jax: 0.10.0
libtpu: 0.0.40
codegen_flags: <defaults>
</compile_context>

<pallas_src>
import functools
import math

import jax
import jax.numpy as jnp
from jax import lax
from jax.experimental import pallas as pl
from jax.experimental.pallas import tpu as pltpu

_NEG_BIG = -1e30


def _round_up(x, m):
    return (x + m - 1) // m * m


def _supcon_kernel(a_ref, bt_ref, lab_r_ref, lab_c_ref, npos_ref, out_ref,
                   m_sc, l_sc, sp_sc, *, loss_scale, eps, n_valid,
                   supcon_wo_uniformity):
    # a_ref     : [tm, Dp]  anchor rows, already scaled by 1/temperature
    # bt_ref    : [Dp, tn]  pre-transposed contrast features
    # lab_*_ref : [tm, 1] / [1, tn] int32 labels (padded cols < any real label)
    # npos_ref  : [tm, 1]   precomputed positive counts per anchor (float32)
    # out_ref   : [tm, 1]   per-anchor loss, written on the last column step
    i = pl.program_id(0)            # row (anchor) block   -- 'parallel'
    k = pl.program_id(1)            # column block         -- reduction axis
    tm = out_ref.shape[0]
    tn = lab_c_ref.shape[1]

    @pl.when(k == 0)
    def _():
        m_sc[...] = jnp.full_like(m_sc, _NEG_BIG)
        l_sc[...] = jnp.zeros_like(l_sc)
        sp_sc[...] = jnp.zeros_like(sp_sc)

    # [tm, tn] logits tile on the MXU with f32 accumulate.  The 1/T scale and
    # the transpose already live in the operands: no per-step elementwise work.
    s = jnp.dot(a_ref[...], bt_ref[...], preferred_element_type=jnp.float32)

    # Masks from tiny per-tile vectors (never an [N, N] input):
    #   same      : same-label mask via [tm,1] x [1,tn] implicit broadcast
    #   not_diag  : excludes self-contrast (single compare, broadcast iotas)
    #   col_valid : real (non-padded) columns, built on a [1, tn] iota only
    same = lab_r_ref[...] == lab_c_ref[...]
    rid = i * tm + lax.broadcasted_iota(jnp.int32, (tm, 1), 0)
    cid = k * tn + lax.broadcasted_iota(jnp.int32, (1, tn), 1)
    not_diag = rid != cid
    col_valid = cid < n_valid

    # Online (flash-style) softmax-denominator accumulation.  The running max
    # is taken over the raw tile: the reference row-max includes the diagonal,
    # padded columns contribute s = 0, and m only enters the final loss through
    # the eps inside log(l + eps), so no masking/select is needed here.
    m_tile = jnp.max(s, axis=1, keepdims=True)
    m_new = jnp.maximum(m_sc[...], m_tile)
    alpha = jnp.exp(m_sc[...] - m_new)
    e = jnp.exp(s - m_new)
    if supcon_wo_uniformity:
        keep = jnp.logical_not(same) & col_valid   # torch: exp(logits)*(1-mask)
    else:
        keep = not_diag & col_valid                # torch: exp(logits)*logits_mask
    l_sc[...] = alpha * l_sc[...] + jnp.sum(jnp.where(keep, e, 0.0),
                                            axis=1, keepdims=True)

    # Numerator: padded columns never match a real label -> no validity AND.
    pos = same & not_diag
    sp_sc[...] += jnp.sum(jnp.where(pos, s, 0.0), axis=1, keepdims=True)
    m_sc[...] = m_new

    @pl.when(k == pl.num_programs(1) - 1)
    def _():
        npos = npos_ref[...]
        # sum_j pos*log_prob = sum_j pos*logit - npos*(row_max + log(denom+eps))
        log_denom = jnp.log(l_sc[...] + eps)
        sum_log_prob = sp_sc[...] - npos * (m_sc[...] + log_denom)
        mean_log_prob_pos = sum_log_prob / (npos + eps)
        out_ref[...] = (-loss_scale) * mean_log_prob_pos


def supcon_loss(features, labels=None, mask=None, *, temperature=0.07,
                base_temperature=None, contrast_mode='all',
                supcon_wo_uniformity=False, eps=1e-5,
                matmul_dtype=jnp.bfloat16, block_m=None, block_n=None):
    """JAX/Pallas equivalent of SupConLoss.forward (contrast_mode='all').

    features: [bsz, n_views, ...] (trailing dims flattened to feature dim)
    labels:   optional [bsz] int labels (None + mask=None == SimCLR / eye mask)

    Note: the default bf16 matmul path folds 1/temperature into a bf16 operand;
    for very small temperatures / unnormalized features use
    matmul_dtype=jnp.float32 for a tight match to the reference.
    """
    if base_temperature is None:
        base_temperature = temperature
    if features.ndim < 3:
        raise ValueError('`features` needs to be [bsz, n_views, ...]')
    if features.ndim > 3:
        features = features.reshape(features.shape[0], features.shape[1], -1)
    bsz, n_views, dim = features.shape

    if labels is not None and mask is not None:
        raise ValueError('Cannot define both `labels` and `mask`')
    if mask is not None:
        # TODO(synk): arbitrary [bsz, bsz] masks (not expressible as labels) are
        # not wired into the mask-free tiled kernel.
        raise NotImplementedError('explicit `mask` not supported in Pallas path')
    if labels is None:
        base_labels = jnp.arange(bsz, dtype=jnp.int32)        # SimCLR eye mask
        counts = jnp.ones((bsz,), jnp.int32)
    else:
        labels = jnp.asarray(labels).reshape(-1)
        if labels.shape[0] != bsz:
            raise ValueError('Num of labels does not match num of features')
        base_labels = labels.astype(jnp.int32)
        # Per-sample same-class counts: O(bsz^2) int compare on labels only.
        counts = jnp.sum(base_labels[None, :] == base_labels[:, None],
                         axis=1).astype(jnp.int32)

    if contrast_mode == 'one':
        # TODO(synk): contrast_mode='one' (anchor = first view only) not wired;
        # the default 'all' mode is implemented below.
        raise NotImplementedError("contrast_mode='one' not implemented")
    if contrast_mode != 'all':
        raise ValueError('Unknown mode: {}'.format(contrast_mode))

    # contrast_feature = cat(unbind(features, 1), 0): view-major stack [n, dim]
    cf = jnp.concatenate([features[:, v, :] for v in range(n_views)],
                         axis=0).astype(jnp.float32)
    n = bsz * n_views
    lab = jnp.tile(base_labels, (n_views,))                           # [n]
    # torch mask.sum(1) per anchor == n_views * same-class count - 1 (diag).
    npos = (n_views * jnp.tile(counts, (n_views,)) - 1).astype(jnp.float32)

    # ---- tile sizes -------------------------------------------------------
    d_pad = _round_up(dim, 128)
    if block_n is None:
        block_n = min(1024, _round_up(n, 256))      # lane-dense, 256-aligned
    block_n = int(block_n)
    if block_m is None:
        n_pad0 = _round_up(n, block_n)
        block_m = n_pad0
        for cand in (512, 256, 128, 64, 32, 16, 8):  # prefer >=2 row blocks
            if 2 * cand <= n_pad0 and n_pad0 % cand == 0:
                block_m = cand
                break
    block_m = int(block_m)
    assert block_m % 8 == 0, block_m
    assert block_n % 128 == 0, block_n
    n_pad = _round_up(n, math.lcm(block_m, block_n))

    # ---- padded operands, built once in the wrapper ------------------------
    inv_temp = 1.0 / float(temperature)
    cf_pad = jnp.pad(cf, ((0, n_pad - n), (0, d_pad - dim)))
    anchors = (cf_pad * inv_temp).astype(matmul_dtype)     # 1/T folded once
    contrasts_t = cf_pad.T.astype(matmul_dtype)            # [d_pad, n_pad]
    pad_label = jnp.min(base_labels) - 1                   # never matches real
    lab_p = jnp.concatenate(
        [lab, jnp.broadcast_to(pad_label, (n_pad - n,)).astype(jnp.int32)])
    lab_row = lab_p.reshape(n_pad, 1)
    lab_col = lab_p.reshape(1, n_pad)
    npos_p = jnp.pad(npos, (0, n_pad - n)).reshape(n_pad, 1)

    kernel = functools.partial(
        _supcon_kernel,
        loss_scale=float(temperature / base_temperature),
        eps=float(eps),
        n_valid=int(n),
        supcon_wo_uniformity=bool(supcon_wo_uniformity),
    )

    grid = (n_pad // block_m, n_pad // block_n)
    per_row = pl.pallas_call(
        kernel,
        out_shape=jax.ShapeDtypeStruct((n_pad, 1), jnp.float32),
        grid_spec=pltpu.PrefetchScalarGridSpec(
            num_scalar_prefetch=0,
            grid=grid,
            in_specs=[
                pl.BlockSpec((block_m, d_pad), lambda i, k: (i, 0)),   # anchors
                pl.BlockSpec((d_pad, block_n), lambda i, k: (0, k)),   # contrasts^T
                pl.BlockSpec((block_m, 1), lambda i, k: (i, 0)),       # row labels
                pl.BlockSpec((1, block_n), lambda i, k: (0, k)),       # col labels
                pl.BlockSpec((block_m, 1), lambda i, k: (i, 0)),       # npos
            ],
            out_specs=pl.BlockSpec((block_m, 1), lambda i, k: (i, 0)),
            scratch_shapes=[pltpu.VMEM((block_m, 1), jnp.float32)] * 3,
        ),
        compiler_params=pltpu.CompilerParams(
            dimension_semantics=("parallel", "arbitrary"),
            # 48 MiB: headroom for 512x1024 tiles + f32 intermediates, still
            # well under v7x's 64 MiB VMEM per TensorCore.
            vmem_limit_bytes=48 * 1024 * 1024),
    )(anchors, contrasts_t, lab_row, lab_col, npos_p)

    # loss.view(anchor_count, batch_size).mean() == mean over all n anchors.
    # Padded rows are sliced off here (their entries are not meaningful).
    return jnp.mean(per_row[:n, 0])


def _supcon_loss_ref(features, labels=None, *, temperature, base_temperature,
                     eps, supcon_wo_uniformity=False):
    """Pure-JAX reference mirroring the PyTorch code (contrast_mode='all')."""
    bsz, n_views, _ = features.shape
    if labels is None:
        base = jnp.eye(bsz, dtype=jnp.float32)
    else:
        labels = labels.reshape(-1, 1)
        base = (labels == labels.T).astype(jnp.float32)
    cf = jnp.concatenate([features[:, v, :] for v in range(n_views)], axis=0)
    anchor_count = contrast_count = n_views
    n = bsz * anchor_count

    adc = (cf @ cf.T) / temperature
    logits = adc - jnp.max(adc, axis=1, keepdims=True)
    mask = jnp.tile(base, (anchor_count, contrast_count))
    logits_mask = 1.0 - jnp.eye(n, dtype=jnp.float32)
    pos_mask = mask * logits_mask
    if supcon_wo_uniformity:
        exp_logits = jnp.exp(logits) * (1.0 - mask)
    else:
        exp_logits = jnp.exp(logits) * logits_mask
    log_prob = logits - jnp.log(jnp.sum(exp_logits, axis=1, keepdims=True) + eps)
    mlpp = jnp.sum(pos_mask * log_prob, axis=1) / (jnp.sum(pos_mask, axis=1) + eps)
    loss = -(temperature / base_temperature) * mlpp
    return jnp.mean(loss.reshape(anchor_count, bsz))


if __name__ == "__main__":
    key = jax.random.PRNGKey(0)
    k_feat, k_lab, k_feat2, k_lab2 = jax.random.split(key, 4)

    temp = 0.07
    bsz, n_views, dim = 8, 2, 32

    # L2-normalized features, as typically fed to SupConLoss.
    feats = jax.random.normal(k_feat, (bsz, n_views, dim), dtype=jnp.float32)
    feats = feats / jnp.linalg.norm(feats, axis=-1, keepdims=True)
    labels = jax.random.randint(k_lab, (bsz,), 0, 3)

    ref = _supcon_loss_ref(feats, labels, temperature=temp,
                           base_temperature=temp, eps=1e-5)

    # 1) default path: bf16 MXU operands, f32 accumulate (loose tolerance).
    loss_bf16 = jax.block_until_ready(
        supcon_loss(feats, labels=labels, temperature=temp))
    assert jnp.isfinite(loss_bf16), loss_bf16
    assert jnp.allclose(loss_bf16, ref, rtol=2e-2, atol=5e-2), (loss_bf16, ref)

    # 2) f32 matmul path: tight match against the reference.
    loss_f32 = jax.block_until_ready(
        supcon_loss(feats, labels=labels, temperature=temp,
                    matmul_dtype=jnp.float32))
    assert jnp.allclose(loss_f32, ref, rtol=1e-4, atol=1e-4), (loss_f32, ref)

    # 3) SimCLR path (labels=None, mask=None).
    loss_simclr = jax.block_until_ready(
        supcon_loss(feats, temperature=temp, matmul_dtype=jnp.float32))
    ref_simclr = _supcon_loss_ref(feats, None, temperature=temp,
                                  base_temperature=temp, eps=1e-5)
    assert jnp.allclose(loss_simclr, ref_simclr, rtol=1e-4, atol=1e-4), (
        loss_simclr, ref_simclr)

    # 4) supcon_wo_uniformity branch.
    loss_wo = jax.block_until_ready(
        supcon_loss(feats, labels=labels, temperature=temp,
                    matmul_dtype=jnp.float32, supcon_wo_uniformity=True))
    ref_wo = _supcon_loss_ref(feats, labels, temperature=temp,
                              base_temperature=temp, eps=1e-5,
                              supcon_wo_uniformity=True)
    assert jnp.allclose(loss_wo, ref_wo, rtol=1e-4, atol=1e-4), (loss_wo, ref_wo)

    # 5) multi-tile grid (2x2 blocks of 128) with padded columns/rows exercised.
    bsz2 = 100                      # N = 200 -> padded to 256 with 128-blocks
    feats2 = jax.random.normal(k_feat2, (bsz2, n_views, dim), dtype=jnp.float32)
    feats2 = feats2 / jnp.linalg.norm(feats2, axis=-1, keepdims=True)
    labels2 = jax.random.randint(k_lab2, (bsz2,), 0, 5)
    loss_tiled = jax.block_until_ready(
        supcon_loss(feats2, labels=labels2, temperature=temp,
                    matmul_dtype=jnp.float32, block_m=128, block_n=128))
    ref_tiled = _supcon_loss_ref(feats2, labels2, temperature=temp,
                                 base_temperature=temp, eps=1e-5)
    assert jnp.allclose(loss_tiled, ref_tiled, rtol=1e-4, atol=1e-4), (
        loss_tiled, ref_tiled)

    # 6) default (auto-tiled) path on the larger problem as well.
    loss_auto = jax.block_until_ready(
        supcon_loss(feats2, labels=labels2, temperature=temp,
                    matmul_dtype=jnp.float32))
    assert jnp.allclose(loss_auto, ref_tiled, rtol=1e-4, atol=1e-4), (
        loss_auto, ref_tiled)

    print("KERNEL_OK")
</pallas_src>

<mosaic_0001>
module attributes {stable_mosaic.version = 11 : i64} {
  func.func @_supcon_kernel(%arg0: i32, %arg1: i32, %arg2: memref<128x128xbf16, #tpu.memory_space<vmem>>, %arg3: memref<128x256xbf16, #tpu.memory_space<vmem>>, %arg4: memref<128x1xi32, #tpu.memory_space<vmem>>, %arg5: memref<1x256xi32, #tpu.memory_space<vmem>>, %arg6: memref<128x1xf32, #tpu.memory_space<vmem>>, %arg7: memref<128x1xf32, #tpu.memory_space<vmem>>, %arg8: memref<128x1xf32, #tpu.memory_space<vmem>>, %arg9: memref<128x1xf32, #tpu.memory_space<vmem>>, %arg10: memref<128x1xf32, #tpu.memory_space<vmem>>) attributes {dimension_semantics = [#tpu.dimension_semantics<parallel>, #tpu.dimension_semantics<arbitrary>], iteration_bounds = array<i64: 2, 1>, scalar_prefetch = 0 : i64, scratch_operands = 3 : i64, tpu.core_type = #tpu.core_type<tc>, window_params = [{transform_indices = @transform_0, window_bounds = array<i64: 128, 128>}, {transform_indices = @transform_1, window_bounds = array<i64: 128, 256>}, {transform_indices = @transform_2, window_bounds = array<i64: 128, 1>}, {transform_indices = @transform_3, window_bounds = array<i64: 1, 256>}, {transform_indices = @transform_4, window_bounds = array<i64: 128, 1>}, {transform_indices = @transform_5, window_bounds = array<i64: 128, 1>}]} {
    %c0_i32 = arith.constant 0 : i32
    %0 = arith.cmpi eq, %arg1, %c0_i32 : i32
    %1 = arith.extui %0 : i1 to i32
    %c0_i32_0 = arith.constant 0 : i32
    %2 = arith.cmpi ne, %1, %c0_i32_0 : i32
    scf.if %2 {
      %cst_29 = arith.constant -1.000000e+30 : f32
      %56 = vector.broadcast %cst_29 : f32 to vector<128x1xf32>
      %c0_30 = arith.constant 0 : index
      %c0_31 = arith.constant 0 : index
      %57 = vector.load %arg8[%c0_30, %c0_31] : memref<128x1xf32, #tpu.memory_space<vmem>>, vector<128x1xf32>
      tpu.vector_store %arg8[%c0_30, %c0_31], %56 {strides = array<i32>} : memref<128x1xf32, #tpu.memory_space<vmem>>, vector<128x1xf32>,
      %cst_32 = arith.constant 0.000000e+00 : f32
      %58 = vector.broadcast %cst_32 : f32 to vector<128x1xf32>
      %c0_33 = arith.constant 0 : index
      %c0_34 = arith.constant 0 : index
      %59 = vector.load %arg9[%c0_33, %c0_34] : memref<128x1xf32, #tpu.memory_space<vmem>>, vector<128x1xf32>
      tpu.vector_store %arg9[%c0_33, %c0_34], %58 {strides = array<i32>} : memref<128x1xf32, #tpu.memory_space<vmem>>, vector<128x1xf32>,
      %cst_35 = arith.constant 0.000000e+00 : f32
      %60 = vector.broadcast %cst_35 : f32 to vector<128x1xf32>
      %c0_36 = arith.constant 0 : index
      %c0_37 = arith.constant 0 : index
      %61 = vector.load %arg10[%c0_36, %c0_37] : memref<128x1xf32, #tpu.memory_space<vmem>>, vector<128x1xf32>
      tpu.vector_store %arg10[%c0_36, %c0_37], %60 {strides = array<i32>} : memref<128x1xf32, #tpu.memory_space<vmem>>, vector<128x1xf32>,
    } else {
    }
    %c0 = arith.constant 0 : index
    %c0_1 = arith.constant 0 : index
    %3 = vector.load %arg2[%c0, %c0_1] : memref<128x128xbf16, #tpu.memory_space<vmem>>, vector<128x128xbf16>
    %c0_2 = arith.constant 0 : index
    %c0_3 = arith.constant 0 : index
    %4 = vector.load %arg3[%c0_2, %c0_3] : memref<128x256xbf16, #tpu.memory_space<vmem>>, vector<128x256xbf16>
    %cst = arith.constant dense<0.000000e+00> : vector<128x256xf32>
    %5 = tpu.matmul %3, %4, %cst {dimension_numbers = #tpu.dot_dimension_numbers<[1], [0], [0], [1], [0, 0, 1, 1], [], []>} : vector<128x128xbf16>, vector<128x256xbf16>, vector<128x256xf32> -> vector<128x256xf32>
    %c0_4 = arith.constant 0 : index
    %c0_5 = arith.constant 0 : index
    %6 = vector.load %arg4[%c0_4, %c0_5] : memref<128x1xi32, #tpu.memory_space<vmem>>, vector<128x1xi32>
    %c0_6 = arith.constant 0 : index
    %c0_7 = arith.constant 0 : index
    %7 = vector.load %arg5[%c0_6, %c0_7] : memref<1x256xi32, #tpu.memory_space<vmem>>, vector<1x256xi32>
    %8 = vector.broadcast %6 : vector<128x1xi32> to vector<128x256xi32>
    %9 = vector.broadcast %7 : vector<1x256xi32> to vector<128x256xi32>
    %10 = arith.cmpi eq, %8, %9 : vector<128x256xi32>
    %c128_i32 = arith.constant 128 : i32
    %11 = arith.muli %arg0, %c128_i32 : i32
    %12 = tpu.iota {dimensions = array<i32: 0>} : vector<128x1xi32>
    %13 = vector.broadcast %11 : i32 to vector<128x1xi32>
    %14 = arith.addi %13, %12 : vector<128x1xi32>
    %c256_i32 = arith.constant 256 : i32
    %15 = arith.muli %arg1, %c256_i32 : i32
    %16 = tpu.iota {dimensions = array<i32: 1>} : vector<1x256xi32>
    %17 = vector.broadcast %15 : i32 to vector<1x256xi32>
    %18 = arith.addi %17, %16 : vector<1x256xi32>
    %19 = vector.broadcast %14 : vector<128x1xi32> to vector<128x256xi32>
    %20 = vector.broadcast %18 : vector<1x256xi32> to vector<128x256xi32>
    %21 = arith.cmpi ne, %19, %20 : vector<128x256xi32>
    %c16_i32 = arith.constant 16 : i32
    %22 = vector.broadcast %c16_i32 : i32 to vector<1x256xi32>
    %23 = arith.cmpi slt, %18, %22 : vector<1x256xi32>
    %cst_8 = arith.constant dense<0xFF800000> : vector<128xf32>
    %24 = vector.multi_reduction <maximumf>, %5, %cst_8 [1] : vector<128x256xf32> to vector<128xf32>
    %25 = vector.shape_cast %24 : vector<128xf32> to vector<128x1xf32>
    %c0_9 = arith.constant 0 : index
    %c0_10 = arith.constant 0 : index
    %26 = vector.load %arg8[%c0_9, %c0_10] : memref<128x1xf32, #tpu.memory_space<vmem>>, vector<128x1xf32>
    %27 = arith.maximumf %26, %25 : vector<128x1xf32>
    %c0_11 = arith.constant 0 : index
    %c0_12 = arith.constant 0 : index
    %28 = vector.load %arg8[%c0_11, %c0_12] : memref<128x1xf32, #tpu.memory_space<vmem>>, vector<128x1xf32>
    %29 = arith.subf %28, %27 : vector<128x1xf32>
    %30 = math.exp %29 : vector<128x1xf32>
    %31 = vector.broadcast %27 : vector<128x1xf32> to vector<128x256xf32>
    %32 = arith.subf %5, %31 : vector<128x256xf32>
    %33 = math.exp %32 : vector<128x256xf32>
    %34 = vector.broadcast %23 : vector<1x256xi1> to vector<128x256xi1>
    %35 = arith.andi %21, %34 : vector<128x256xi1>
    %c0_13 = arith.constant 0 : index
    %c0_14 = arith.constant 0 : index
    %36 = vector.load %arg9[%c0_13, %c0_14] : memref<128x1xf32, #tpu.memory_space<vmem>>, vector<128x1xf32>
    %37 = arith.mulf %30, %36 : vector<128x1xf32>
    %cst_15 = arith.constant 0.000000e+00 : f32
    %38 = vector.broadcast %cst_15 : f32 to vector<128x256xf32>
    %39 = arith.select %35, %33, %38 : vector<128x256xi1>, vector<128x256xf32>
    %cst_16 = arith.constant dense<0.000000e+00> : vector<128xf32>
    %40 = vector.multi_reduction <add>, %39, %cst_16 [1] : vector<128x256xf32> to vector<128xf32>
    %41 = vector.shape_cast %40 : vector<128xf32> to vector<128x1xf32>
    %42 = arith.addf %37, %41 : vector<128x1xf32>
    %c0_17 = arith.constant 0 : index
    %c0_18 = arith.constant 0 : index
    %43 = vector.load %arg9[%c0_17, %c0_18] : memref<128x1xf32, #tpu.memory_space<vmem>>, vector<128x1xf32>
    tpu.vector_store %arg9[%c0_17, %c0_18], %42 {strides = array<i32>} : memref<128x1xf32, #tpu.memory_space<vmem>>, vector<128x1xf32>,
    %44 = arith.andi %10, %21 : vector<128x256xi1>
    %c0_19 = arith.constant 0 : index
    %c0_20 = arith.constant 0 : index
    %45 = vector.load %arg10[%c0_19, %c0_20] : memref<128x1xf32, #tpu.memory_space<vmem>>, vector<128x1xf32>
    %cst_21 = arith.constant 0.000000e+00 : f32
    %46 = vector.broadcast %cst_21 : f32 to vector<128x256xf32>
    %47 = arith.select %44, %5, %46 : vector<128x256xi1>, vector<128x256xf32>
    %cst_22 = arith.constant dense<0.000000e+00> : vector<128xf32>
    %48 = vector.multi_reduction <add>, %47, %cst_22 [1] : vector<128x256xf32> to vector<128xf32>
    %49 = vector.shape_cast %48 : vector<128xf32> to vector<128x1xf32>
    %50 = arith.addf %45, %49 : vector<128x1xf32>
    %c0_23 = arith.constant 0 : index
    %c0_24 = arith.constant 0 : index
    %51 = vector.load %arg10[%c0_23, %c0_24] : memref<128x1xf32, #tpu.memory_space<vmem>>, vector<128x1xf32>
    tpu.vector_store %arg10[%c0_23, %c0_24], %50 {strides = array<i32>} : memref<128x1xf32, #tpu.memory_space<vmem>>, vector<128x1xf32>,
    %c0_25 = arith.constant 0 : index
    %c0_26 = arith.constant 0 : index
    %52 = vector.load %arg8[%c0_25, %c0_26] : memref<128x1xf32, #tpu.memory_space<vmem>>, vector<128x1xf32>
    tpu.vector_store %arg8[%c0_25, %c0_26], %27 {strides = array<i32>} : memref<128x1xf32, #tpu.memory_space<vmem>>, vector<128x1xf32>,
    %c0_i32_27 = arith.constant 0 : i32
    %53 = arith.cmpi eq, %arg1, %c0_i32_27 : i32
    %54 = arith.extui %53 : i1 to i32
    %c0_i32_28 = arith.constant 0 : i32
    %55 = arith.cmpi ne, %54, %c0_i32_28 : i32
    scf.if %55 {
      %c0_29 = arith.constant 0 : index
      %c0_30 = arith.constant 0 : index
      %56 = vector.load %arg6[%c0_29, %c0_30] : memref<128x1xf32, #tpu.memory_space<vmem>>, vector<128x1xf32>
      %c0_31 = arith.constant 0 : index
      %c0_32 = arith.constant 0 : index
      %57 = vector.load %arg9[%c0_31, %c0_32] : memref<128x1xf32, #tpu.memory_space<vmem>>, vector<128x1xf32>
      %cst_33 = arith.constant 9.99999974E-6 : f32
      %58 = vector.broadcast %cst_33 : f32 to vector<128x1xf32>
      %59 = arith.addf %57, %58 : vector<128x1xf32>
      %60 = math.log %59 : vector<128x1xf32>
      %c0_34 = arith.constant 0 : index
      %c0_35 = arith.constant 0 : index
      %61 = vector.load %arg10[%c0_34, %c0_35] : memref<128x1xf32, #tpu.memory_space<vmem>>, vector<128x1xf32>
      %c0_36 = arith.constant 0 : index
      %c0_37 = arith.constant 0 : index
      %62 = vector.load %arg8[%c0_36, %c0_37] : memref<128x1xf32, #tpu.memory_space<vmem>>, vector<128x1xf32>
      %63 = arith.addf %62, %60 : vector<128x1xf32>
      %64 = arith.mulf %56, %63 : vector<128x1xf32>
      %65 = arith.subf %61, %64 : vector<128x1xf32>
      %cst_38 = arith.constant 9.99999974E-6 : f32
      %66 = vector.broadcast %cst_38 : f32 to vector<128x1xf32>
      %67 = arith.addf %56, %66 : vector<128x1xf32>
      %68 = arith.divf %65, %67 : vector<128x1xf32>
      %cst_39 = arith.constant -1.000000e+00 : f32
      %69 = vector.broadcast %cst_39 : f32 to vector<128x1xf32>
      %70 = arith.mulf %69, %68 : vector<128x1xf32>
      %c0_40 = arith.constant 0 : index
      %c0_41 = arith.constant 0 : index
      %71 = vector.load %arg7[%c0_40, %c0_41] : memref<128x1xf32, #tpu.memory_space<vmem>>, vector<128x1xf32>
      tpu.vector_store %arg7[%c0_40, %c0_41], %70 {strides = array<i32>} : memref<128x1xf32, #tpu.memory_space<vmem>>, vector<128x1xf32>,
    } else {
    }
    return
  }
  func.func @transform_0(%arg0: i32, %arg1: i32) -> (i32, i32) {
    %c0_i32 = arith.constant 0 : i32
    %c0_i32_0 = arith.constant 0 : i32
    return %arg0, %c0_i32 : i32, i32
  }
  func.func @transform_1(%arg0: i32, %arg1: i32) -> (i32, i32) {
    %c0_i32 = arith.constant 0 : i32
    %c0_i32_0 = arith.constant 0 : i32
    return %c0_i32, %arg1 : i32, i32
  }
  func.func @transform_2(%arg0: i32, %arg1: i32) -> (i32, i32) {
    %c0_i32 = arith.constant 0 : i32
    %c0_i32_0 = arith.constant 0 : i32
    return %arg0, %c0_i32 : i32, i32
  }
  func.func @transform_3(%arg0: i32, %arg1: i32) -> (i32, i32) {
    %c0_i32 = arith.constant 0 : i32
    %c0_i32_0 = arith.constant 0 : i32
    return %c0_i32, %arg1 : i32, i32
  }
  func.func @transform_4(%arg0: i32, %arg1: i32) -> (i32, i32) {
    %c0_i32 = arith.constant 0 : i32
    %c0_i32_0 = arith.constant 0 : i32
    return %arg0, %c0_i32 : i32, i32
  }
  func.func @transform_5(%arg0: i32, %arg1: i32) -> (i32, i32) {
    %c0_i32 = arith.constant 0 : i32
    %c0_i32_0 = arith.constant 0 : i32
    return %arg0, %c0_i32 : i32, i32
  }
}

</mosaic_0001>

<bundles_post_ra>
// kernel: tpu_custom_call.1
= control target key start
LH: loop header
LB: loop body
LE: loop exit
PB: predicated region body
PF: predicated region fallthrough
CT: control target
= control target key end

     0   :  { %s2157_s18 = smov 0   ;;  %s2159_s19 = smov 0   ;;  %s3303_s0 = inlined_call_operand.vmem [shape: bf16[256,128], index: 0, kind: input, shape index: {}]   ;;  %s3304_s1 = inlined_call_operand.vmem [shape: bf16[128,256], index: 1, kind: input, shape index: {}]   ;;  %s3305_s2 = inlined_call_operand.vmem [shape: s32[256,1], index: 2, kind: input, shape index: {}]   ;;  %s3306_s3 = inlined_call_operand.vmem [shape: s32[1,256], index: 3, kind: input, shape index: {}]   ;;  %s3307_s4 = inlined_call_operand.vmem [shape: f32[256,1], index: 4, kind: input, shape index: {}]   ;;  %s3308_s5 = inlined_call_operand.vmem [shape: f32[256,1], index: 5, kind: output, shape index: {}]  }
   0x1   :  { %s2161_s20 = smov 0  }
   0x2 LB: > { %s27_s21 = sadd.s32 1, %s2118_s19  ;;  %p1859_p0 = scmp.ge.s32.totalorder %s2122_s20, 1  ;;  %s2122_s20 = sphi %s2161_s20, %s15_s20   ;;  %s2118_s19 = sphi %s2159_s19, %s3489_s19   ;;  %s2114_s18 = sphi %s2157_s18, %s3488_s18  }
   0x3   : > { %p29_p1 = scmp.ge.s32.totalorder %s27_s21, 2  ;;  %p243_p2 = scmp.lt.s32.totalorder %s2122_s20, 3 }
   0x5   : > { %s3491_s21 = smov (%p29_p1, %s27_s21), 0  ;;  %p244_p3 = pnand %p1859_p0, %p243_p2 }
   0x7   : > { %247 = sbr.rel (%p244_p3) target bundleno = 830 (0x33e), region = 40 }
   0xe   : > { %v1940_v0 = vld [vmem:[%s3304_s1 + $0x4] ss:$8 sps:$4 sm:$0xff]   ;;  %s1860_s24 = sshll.u32 %s2114_s18, 4  ;;  %v1942_v1 = vld [vmem:[%s3304_s1] ss:$8 sps:$4 sm:$0xff]   ;;  %v2124_v2 = vmov 0   ;;  %v717_v28 = vlaneseq }
   0xf   : > { %571 = vmatprep.mubr.bf16.mxu0 %v2124_v2  ;;  %611 = vmatprep.mubr.bf16.mxu1 %v2124_v2  ;;  %p291_p4 = scmp.lt.s32.totalorder %s1860_s24, 31  ;;  %v1943_v3 = vld [vmem:[%s3304_s1 + $0x14] ss:$8 sps:$4 sm:$0xff]   ;;  %v1945_v4 = vld [vmem:[%s3304_s1 + $0x10] ss:$8 sps:$4 sm:$0xff]   ;;  %vm3332_vm0 = vcmask 7168  }
  0x10   : > { %539 = vmatprep.subr.bf16.mxu0 %v1940_v0  ;;  %1895 = vmatprep.subr.bf16.mxu1 %v1940_v0  ;;  %v1946_v5 = vld [vmem:[%s3304_s1 + $0x24] ss:$8 sps:$4 sm:$0xff]   ;;  %v1948_v6 = vld [vmem:[%s3304_s1 + $0x20] ss:$8 sps:$4 sm:$0xff]   ;;  %v1949_v7 = vld [vmem:[%s3304_s1 + $0x34] ss:$8 sps:$4 sm:$0xff]  }
  0x11   : > { %540 = vmatpush1.bf16.msra.mxu0 %v1942_v1  ;;  %1903 = vmatpush1.bf16.msra.mxu1 %v1942_v1  ;;  %s3493_s24 = smov (!%p291_p4, %s1860_s24), 31  ;;  %v1951_v8 = vld [vmem:[%s3304_s1 + $0x30] ss:$8 sps:$4 sm:$0xff]   ;;  %v1952_v9 = vld [vmem:[%s3304_s1 + $0x44] ss:$8 sps:$4 sm:$0xff]   ;;  %v2275_v29 = vshrl.u32 %v717_v28, 7 }
  0x12   : > { %541 = vmatprep.subr.bf16.mxu0 %v1943_v3  ;;  %1896 = vmatprep.subr.bf16.mxu1 %v1943_v3  ;;  %s1861_s8 = sshll.u32 %s3493_s24, 2  ;;  %s2211_s22 = sshll.u32 %s3493_s24, 3  ;;  %v1954_v10 = vld [vmem:[%s3304_s1 + $0x40] ss:$8 sps:$4 sm:$0xff]   ;;  %v1955_v11 = vld [vmem:[%s3304_s1 + $0x54] ss:$8 sps:$4 sm:$0xff]  }
  0x13   : > { %1938 = vset.pattern.permute.xlu0 %v2124_v2  ;;  %1939 = vset.pattern.permute.xlu1 %v2124_v2  ;;  %s2206_s15 = scalar_lea.vmem %s3303_s0, %s1861_s8  ;;  %s2223_s30 = scalar_lea.vmem %s3305_s2, %s2211_s22  ;;  %v1957_v13 = vld [vmem:[%s3304_s1 + $0x50] ss:$8 sps:$4 sm:$0xff]   ;;  %v1958_v14 = vld [vmem:[%s3304_s1 + $0x64] ss:$8 sps:$4 sm:$0xff]   ;;  %v1960_v16 = vld [vmem:[%s3304_s1 + $0x60] ss:$8 sps:$4 sm:$0xff]  }
  0x14   : > { %v652_v12 = vld [vmem:[%s2223_s30] sm:$0xff]  ;;  %v653_v15 = vld [vmem:[%s2223_s30 + $0x8] sm:$0xff]  ;;  %v1961_v17 = vld [vmem:[%s3304_s1 + $0x74] ss:$8 sps:$4 sm:$0xff]   ;;  %v2125_v27 = vmov -1e+30   ;;  %s3138_s27 = scalar_lea.vmem %s3307_s4, %s2211_s22 }
  0x15   : > { %542 = vmatpush1.bf16.msra.mxu0 %v1945_v4  ;;  %1904 = vmatpush1.bf16.msra.mxu1 %v1945_v4  ;;  %v1963_v18 = vld [vmem:[%s3304_s1 + $0x70] ss:$8 sps:$4 sm:$0xff]   ;;  %v1964_v19 = vld [vmem:[%s2206_s15] sm:$0xff]   ;;  %v1966_v21 = vld [vmem:[%s2206_s15 + $0x8] sm:$0xff]   ;;  %331 = vst.msk [vmem:[#allocation2] sm:$0xff] %vm3332_vm0, %v2125_v27  ;;  %v719_v30 = vsub.s32 0, %v2275_v29 }
  0x16   : > { %543 = vmatprep.subr.bf16.mxu0 %v1946_v5  ;;  %1897 = vmatprep.subr.bf16.mxu1 %v1946_v5  ;;  %v1965_v20 = vld [vmem:[%s2206_s15 + $0x20] sm:$0xff]   ;;  %v1967_v22 = vld [vmem:[%s2206_s15 + $0x28] sm:$0xff]   ;;  %v1968_v23 = vld [vmem:[%s2206_s15 + $0x30] sm:$0xff]   ;;  %332 = vst.msk [vmem:[#allocation2 + $0x8] sm:$0xff] %vm3332_vm0, %v2125_v27  ;;  %v723_v32 = vsub.s32 1, %v2275_v29  ;;  %v2285_v34 = vand.u32 127, %v717_v28 }
  0x17   : > { %670 = vperm.xlu0 %1938, %v652_v12   ;;  %v1969_v24 = vld [vmem:[%s2206_s15 + $0x10] sm:$0xff]   ;;  %v1970_v25 = vld [vmem:[%s2206_s15 + $0x18] sm:$0xff]   ;;  %333 = vst.msk [vmem:[#allocation2 + $0x10] sm:$0xff] %vm3332_vm0, %v2125_v27  ;;  %334 = vst.msk [vmem:[#allocation2 + $0x18] sm:$0xff] %vm3332_vm0, %v2125_v27  ;;  %v760_v36 = vadd.s32 8, %v2275_v29  ;;  %v2126_v44 = vmov 0.0  }
  0x18   : > { %v1971_v26 = vld [vmem:[%s2206_s15 + $0x38] sm:$0xff]   ;;  %335 = vst.msk [vmem:[#allocation2 + $0x20] sm:$0xff] %vm3332_vm0, %v2125_v27  ;;  %336 = vst.msk [vmem:[#allocation2 + $0x28] sm:$0xff] %vm3332_vm0, %v2125_v27  ;;  %s1892_s15 = sshll.u32 %s2114_s18, 7  ;;  %v668_v31 = vld [vmem:[%s3306_s3] sm:$0x3] }
  0x19   : > { %544 = vmatpush1.bf16.msra.mxu0 %v1948_v6  ;;  %1905 = vmatpush1.bf16.msra.mxu1 %v1948_v6  ;;  %337 = vst.msk [vmem:[#allocation2 + $0x30] sm:$0xff] %vm3332_vm0, %v2125_v27  ;;  %338 = vst.msk [vmem:[#allocation2 + $0x38] sm:$0xff] %vm3332_vm0, %v2125_v27  ;;  %v2283_v33 = vstv %s1892_s15  ;;  %v2288_v37 = vrot.slane %v668_v31, %v719_v30  ;;  %v2294_v39 = vrot.slane %v668_v31, %v723_v32  ;;  %v655_v45 = vld [vmem:[%s2223_s30 + $0x18] sm:$0xff] }
  0x1a   : > { %545 = vmatprep.subr.bf16.mxu0 %v1949_v7  ;;  %1898 = vmatprep.subr.bf16.mxu1 %v1949_v7  ;;  %339 = vst.msk [vmem:[#allocation2 + $0x40] sm:$0xff] %vm3332_vm0, %v2125_v27  ;;  %340 = vst.msk [vmem:[#allocation2 + $0x48] sm:$0xff] %vm3332_vm0, %v2125_v27  ;;  %v2292_v38 = vadd.s32 %v2283_v33, %v2275_v29  ;;  %v2297_v40 = vadd.s32 128, %v2285_v34  ;;  %v2300_v41 = vadd.s32 %v2283_v33, %v760_v36 }
  0x1b   : > { %673 = vperm.xlu0 %1938, %v653_v15   ;;  %341 = vst.msk [vmem:[#allocation2 + $0x50] sm:$0xff] %vm3332_vm0, %v2125_v27  ;;  %342 = vst.msk [vmem:[#allocation2 + $0x58] sm:$0xff] %vm3332_vm0, %v2125_v27 }
  0x1c   : > { %343 = vst.msk [vmem:[#allocation2 + $0x60] sm:$0xff] %vm3332_vm0, %v2125_v27  ;;  %344 = vst.msk [vmem:[#allocation2 + $0x68] sm:$0xff] %vm3332_vm0, %v2125_v27  ;;  %vm799_vm1 = vcmp.ne.s32.totalorder %v2292_v38, %v2285_v34  ;;  %vm800_vm4 = vcmp.ne.s32.totalorder %v2292_v38, %v2297_v40  ;;  %vm801_vm5 = vcmp.ne.s32.totalorder %v2300_v41, %v2285_v34 }
  0x1d   : > { %546 = vmatpush1.bf16.msra.mxu0 %v1951_v8  ;;  %1906 = vmatpush1.bf16.msra.mxu1 %v1951_v8  ;;  %345 = vst.msk [vmem:[#allocation2 + $0x70] sm:$0xff] %vm3332_vm0, %v2125_v27  ;;  %346 = vst.msk [vmem:[#allocation2 + $0x78] sm:$0xff] %vm3332_vm0, %v2125_v27  ;;  %vm802_vm9 = vcmp.ne.s32.totalorder %v2300_v41, %v2297_v40 }
  0x1e   : > { %547 = vmatprep.subr.bf16.mxu0 %v1952_v9  ;;  %1899 = vmatprep.subr.bf16.mxu1 %v1952_v9  ;;  %364 = vst.msk [vmem:[#allocation4 + $0x8] sm:$0xff] %vm3332_vm0, %v2126_v44  ;;  %347 = vst.msk [vmem:[#allocation3] sm:$0xff] %vm3332_vm0, %v2126_v44 }
  0x1f   : > { %348 = vst.msk [vmem:[#allocation3 + $0x8] sm:$0xff] %vm3332_vm0, %v2126_v44  ;;  %349 = vst.msk [vmem:[#allocation3 + $0x10] sm:$0xff] %vm3332_vm0, %v2126_v44 }
  0x20   : > { %350 = vst.msk [vmem:[#allocation3 + $0x18] sm:$0xff] %vm3332_vm0, %v2126_v44  ;;  %351 = vst.msk [vmem:[#allocation3 + $0x20] sm:$0xff] %vm3332_vm0, %v2126_v44 }
  0x21   : > { %548 = vmatpush1.bf16.msra.mxu0 %v1954_v10  ;;  %1907 = vmatpush1.bf16.msra.mxu1 %v1954_v10  ;;  %352 = vst.msk [vmem:[#allocation3 + $0x28] sm:$0xff] %vm3332_vm0, %v2126_v44  ;;  %353 = vst.msk [vmem:[#allocation3 + $0x30] sm:$0xff] %vm3332_vm0, %v2126_v44 }
  0x22   : > { %549 = vmatprep.subr.bf16.mxu0 %v1955_v11  ;;  %1900 = vmatprep.subr.bf16.mxu1 %v1955_v11  ;;  %354 = vst.msk [vmem:[#allocation3 + $0x38] sm:$0xff] %vm3332_vm0, %v2126_v44  ;;  %355 = vst.msk [vmem:[#allocation3 + $0x40] sm:$0xff] %vm3332_vm0, %v2126_v44 }
  0x23   : > { %356 = vst.msk [vmem:[#allocation3 + $0x48] sm:$0xff] %vm3332_vm0, %v2126_v44  ;;  %357 = vst.msk [vmem:[#allocation3 + $0x50] sm:$0xff] %vm3332_vm0, %v2126_v44 }
  0x24   : > { %358 = vst.msk [vmem:[#allocation3 + $0x58] sm:$0xff] %vm3332_vm0, %v2126_v44  ;;  %359 = vst.msk [vmem:[#allocation3 + $0x60] sm:$0xff] %vm3332_vm0, %v2126_v44 }
  0x25   : > { %550 = vmatpush1.bf16.msra.mxu0 %v1957_v13  ;;  %1908 = vmatpush1.bf16.msra.mxu1 %v1957_v13  ;;  %360 = vst.msk [vmem:[#allocation3 + $0x68] sm:$0xff] %vm3332_vm0, %v2126_v44  ;;  %361 = vst.msk [vmem:[#allocation3 + $0x70] sm:$0xff] %vm3332_vm0, %v2126_v44 }
  0x26   : > { %551 = vmatprep.subr.bf16.mxu0 %v1958_v14  ;;  %1901 = vmatprep.subr.bf16.mxu1 %v1958_v14  ;;  %362 = vst.msk [vmem:[#allocation3 + $0x78] sm:$0xff] %vm3332_vm0, %v2126_v44  ;;  %363 = vst.msk [vmem:[#allocation4] sm:$0xff] %vm3332_vm0, %v2126_v44 }
  0x27   : > { %365 = vst.msk [vmem:[#allocation4 + $0x10] sm:$0xff] %vm3332_vm0, %v2126_v44  ;;  %366 = vst.msk [vmem:[#allocation4 + $0x18] sm:$0xff] %vm3332_vm0, %v2126_v44 }
  0x28   : > { %367 = vst.msk [vmem:[#allocation4 + $0x20] sm:$0xff] %vm3332_vm0, %v2126_v44  ;;  %368 = vst.msk [vmem:[#allocation4 + $0x28] sm:$0xff] %vm3332_vm0, %v2126_v44 }
  0x29   : > { %552 = vmatpush1.bf16.msra.mxu0 %v1960_v16  ;;  %1909 = vmatpush1.bf16.msra.mxu1 %v1960_v16  ;;  %369 = vst.msk [vmem:[#allocation4 + $0x30] sm:$0xff] %vm3332_vm0, %v2126_v44  ;;  %370 = vst.msk [vmem:[#allocation4 + $0x38] sm:$0xff] %vm3332_vm0, %v2126_v44 }
  0x2a   : > { %553 = vmatprep.subr.bf16.mxu0 %v1961_v17  ;;  %1902 = vmatprep.subr.bf16.mxu1 %v1961_v17  ;;  %371 = vst.msk [vmem:[#allocation4 + $0x40] sm:$0xff] %vm3332_vm0, %v2126_v44  ;;  %372 = vst.msk [vmem:[#allocation4 + $0x48] sm:$0xff] %vm3332_vm0, %v2126_v44 }
  0x2b   : > { %373 = vst.msk [vmem:[#allocation4 + $0x50] sm:$0xff] %vm3332_vm0, %v2126_v44  ;;  %374 = vst.msk [vmem:[#allocation4 + $0x58] sm:$0xff] %vm3332_vm0, %v2126_v44 }
  0x2c   : > { %375 = vst.msk [vmem:[#allocation4 + $0x60] sm:$0xff] %vm3332_vm0, %v2126_v44  ;;  %376 = vst.msk [vmem:[#allocation4 + $0x68] sm:$0xff] %vm3332_vm0, %v2126_v44 }
  0x2d   : > { %554 = vmatpush1.bf16.msra.mxu0 %v1963_v18  ;;  %1910 = vmatpush1.bf16.msra.mxu1 %v1963_v18  ;;  %377 = vst.msk [vmem:[#allocation4 + $0x70] sm:$0xff] %vm3332_vm0, %v2126_v44  ;;  %378 = vst.msk [vmem:[#allocation4 + $0x78] sm:$0xff] %vm3332_vm0, %v2126_v44 }
  0x30   : > { %572 = vmatmul.mubr.bf16.vlgmr.msra.gmra.mrb[0].mxu0 %v1964_v19  ;;  %612 = vmatmul.mubr.bf16.vlgmr.msra.gmra.mrb[0].mxu1 %v1965_v20 }
  0x31   : > { %581 = vmatprep.mubr.bf16.mxu0 %v2124_v2  ;;  %621 = vmatprep.mubr.bf16.mxu1 %v2124_v2 }
  0x38   : > { %582 = vmatmul.mubr.bf16.gmra.mrb[4].mxu0 %v1966_v21  ;;  %622 = vmatmul.mubr.bf16.gmra.mrb[4].mxu1 %v1967_v22 }
  0x39   : > { %631 = vmatprep.mubr.bf16.mxu1 %v2124_v2  ;;  %591 = vmatprep.mubr.bf16.mxu0 %v2124_v2 }
  0x40   : > { %632 = vmatmul.mubr.bf16.gmra.mrb[8].mxu1 %v1968_v23  ;;  %592 = vmatmul.mubr.bf16.gmra.mrb[8].mxu0 %v1969_v24 }
  0x41   : > { %601 = vmatprep.mubr.bf16.mxu0 %v2124_v2  ;;  %641 = vmatprep.mubr.bf16.mxu1 %v2124_v2 }
  0x48   : > { %602 = vmatmul.mubr.bf16.gmra.mrb[12].mxu0 %v1970_v25  ;;  %642 = vmatmul.mubr.bf16.gmra.mrb[12].mxu1 %v1971_v26 }
  0x96   : > { %v671_v35 = vpop.permute.xlu0 %670 }
  0x97   : > { %vm725_vm2 = vcmp.eq.s32.totalorder %v671_v35, %v2288_v37  ;;  %vm726_vm3 = vcmp.eq.s32.totalorder %v671_v35, %v2294_v39 }
  0x98   : > { %vm2314_vm7 = vmand %vm725_vm2, %vm799_vm1 }
  0x99   : > { %vm2321_vm10 = vmand %vm726_vm3, %vm800_vm4 }
  0x9a   : > { %v674_v42 = vpop.permute.xlu0 %673 }
  0x9b   : > { %vm727_vm6 = vcmp.eq.s32.totalorder %v674_v42, %v2288_v37  ;;  %vm728_vm8 = vcmp.eq.s32.totalorder %v674_v42, %v2294_v39 }
  0x9c   : > { %vm2328_vm11 = vmand %vm727_vm6, %vm801_vm5 }
  0x9d   : > { %vm1321_vm12 = vmand %vm728_vm8, %vm802_vm9 }
 0x103   : > { %v2332_v46 = vpop.f32.mrb[0].mxu0  ;;  %v2334_v47 = vpop.f32.mrb[0].mxu1 }
 0x104   : > { %v575_v48 = vpop.f32.mrb[1].mxu0  ;;  %v2336_v49 = vpop.f32.mrb[1].mxu1  ;;  %v1366_v50 = vsel %vm2314_vm7, %v2332_v46, 0.0 }
 0x105   : > { %v1367_v51 = vsel %vm2321_vm10, %v575_v48, 0.0  ;;  %v2343_v52 = vpop.f32.mrb[2].mxu0  ;;  %v2345_v53 = vpop.f32.mrb[2].mxu1  ;;  %v833_v54 = vmax.f32 %v2332_v46, %v575_v48  ;;  %v857_v55 = vmax.f32 %v2334_v47, %v2336_v49  ;;  %v654_v48 = vld [vmem:[%s2223_s30 + $0x10] sm:$0xff] }
 0x106   : > { %v579_v56 = vpop.f32.mrb[3].mxu0  ;;  %v2350_v57 = vpop.f32.mrb[3].mxu1  ;;  %v1368_v58 = vsel %vm2328_vm11, %v2343_v52, 0.0  ;;  %v2355_v59 = vadd.f32 %v1367_v51, %v1366_v50  ;;  %v656_v50 = vld [vmem:[%s2223_s30 + $0x20] sm:$0xff] }
 0x107   : > { %v1369_v60 = vsel %vm1321_vm12, %v579_v56, 0.0  ;;  %834 = vmax.xlane.f32.xlu1 %v833_v54  ;;  %v836_v61 = vmax.f32 %v2343_v52, %v579_v56  ;;  %v860_v62 = vmax.f32 %v2345_v53, %v2350_v57  ;;  %v2470_v51 = vld [vmem:[#allocation2] sm:$0xff] }
 0x108   : > { %v2360_v63 = vadd.f32 %v1369_v60, %v1368_v58  ;;  %v2475_v56 = vld [vmem:[#allocation2 + $0x40] sm:$0xff] }
 0x109   : > { %v2555_v58 = vld [vmem:[#allocation2 + $0x20] sm:$0xff] }
 0x10b   : > { %v2362_v0 = vpop.f32.mrb[4].mxu1  ;;  %858 = vmax.xlane.f32.xlu1 %v857_v55  ;;  %v2364_v1 = vpop.f32.mrb[4].mxu0 }
 0x10c   : > { %v2366_v2 = vpop.f32.mrb[5].mxu0  ;;  %v2368_v3 = vpop.f32.mrb[5].mxu1 }
 0x10d   : > { %v2370_v4 = vpop.f32.mrb[6].mxu0  ;;  %v2372_v5 = vpop.f32.mrb[6].mxu1  ;;  %v839_v6 = vmax.f32 %v2364_v1, %v2366_v2  ;;  %v863_v7 = vmax.f32 %v2362_v0, %v2368_v3 }
 0x10e   : > { %v2378_v8 = vpop.f32.mrb[7].mxu0  ;;  %v2380_v9 = vpop.f32.mrb[7].mxu1 }
 0x10f   : > { %837 = vmax.xlane.f32.xlu1 %v836_v61  ;;  %840 = vmax.xlane.f32.xlu0 %v839_v6  ;;  %v866_v10 = vmax.f32 %v2372_v5, %v2380_v9  ;;  %v842_v11 = vmax.f32 %v2370_v4, %v2378_v8 }
 0x113   : > { %v2386_v12 = vpop.f32.mrb[8].mxu1  ;;  %861 = vmax.xlane.f32.xlu1 %v860_v62  ;;  %867 = vmax.xlane.f32.xlu0 %v866_v10  ;;  %v2388_v13 = vpop.f32.mrb[8].mxu0  ;;  %v2485_v62 = vld [vmem:[#allocation2 + $0x8] sm:$0xff] }
 0x114   : > { %v2390_v14 = vpop.f32.mrb[9].mxu1  ;;  %v2392_v15 = vpop.f32.mrb[9].mxu0 }
 0x115   : > { %v2394_v16 = vpop.f32.mrb[10].mxu1  ;;  %v845_v17 = vmax.f32 %v2388_v13, %v2392_v15  ;;  %v869_v18 = vmax.f32 %v2386_v12, %v2390_v14  ;;  %v2400_v19 = vpop.f32.mrb[10].mxu0 }
 0x116   : > { %v2402_v20 = vpop.f32.mrb[11].mxu1  ;;  %v2404_v21 = vpop.f32.mrb[11].mxu0 }
 0x117   : > { %864 = vmax.xlane.f32.xlu1 %v863_v7  ;;  %v872_v22 = vmax.f32 %v2394_v16, %v2402_v20  ;;  %v848_v23 = vmax.f32 %v2400_v19, %v2404_v21 }
 0x119   : > { %873 = vmax.xlane.f32.xlu0 %v872_v22  ;;  %v2502_v22 = vld [vmem:[#allocation2 + $0x58] sm:$0xff] }
 0x11a   : > { %3346 = vst [vmem:[#allocation8_spill] sm:$0xff] %v2502_v22 }
 0x11b   : > { %843 = vmax.xlane.f32.xlu1 %v842_v11  ;;  %v2410_v24 = vpop.f32.mrb[12].mxu0  ;;  %v2412_v25 = vpop.f32.mrb[12].mxu1 }
 0x11c   : > { %v2414_v26 = vpop.f32.mrb[13].mxu0  ;;  %v2416_v27 = vpop.f32.mrb[13].mxu1 }
 0x11d   : > { %v851_v28 = vmax.f32 %v2410_v24, %v2414_v26  ;;  %v2420_v30 = vpop.f32.mrb[14].mxu0  ;;  %v875_v31 = vmax.f32 %v2412_v25, %v2416_v27  ;;  %v2424_v32 = vpop.f32.mrb[14].mxu1 }
 0x11e   : > { %v2426_v35 = vpop.f32.mrb[15].mxu0  ;;  %v2428_v36 = vpop.f32.mrb[15].mxu1 }
 0x11f   : > { %846 = vmax.xlane.f32.xlu1 %v845_v17  ;;  %v854_v42 = vmax.f32 %v2420_v30, %v2426_v35  ;;  %v878_v43 = vmax.f32 %v2424_v32, %v2428_v36 }
 0x123   : > { %870 = vmax.xlane.f32.xlu1 %v869_v18  ;;  %v2500_v18 = vld [vmem:[#allocation2 + $0x48] sm:$0xff] }
 0x124   : > { %3345 = vst [vmem:[#allocation7_spill] sm:$0xff] %v2500_v18 }
 0x127   : > { %849 = vmax.xlane.f32.xlu1 %v848_v23 }
 0x12b   : > { %852 = vmax.xlane.f32.xlu1 %v851_v28 }
 0x12f   : > { %679 = vperm.xlu0 %1938, %v655_v45   ;;  %855 = vmax.xlane.f32.xlu1 %v854_v42  ;;  %v2519_v45 = vld [vmem:[#allocation2 + $0x50] sm:$0xff] }
 0x133   : > { %876 = vmax.xlane.f32.xlu1 %v875_v31 }
 0x144   : > { %676 = vperm.xlu1 %1939, %v654_v48  }
 0x148   : > { %682 = vperm.xlu1 %1939, %v656_v50  }
 0x14e   : > { %879 = vmax.xlane.f32.xlu0 %v878_v43 }
 0x152   : > { %1402 = vadd.xlane.f32.xlu0 %v2360_v63  ;;  %v2487_v63 = vld [vmem:[#allocation2 + $0x10] sm:$0xff] }
 0x153   : > { %3343 = vst [vmem:[#allocation5_spill] sm:$0xff] %v2487_v63 }
 0x194   : > { %v835_v54 = vpop.xlane.xlu1 %834 }
 0x195   : > { %v2473_v55 = vmax.f32 %v2470_v51, %v835_v54 }
 0x197   : > { %1478 = vst.msk [vmem:[#allocation2] sm:$0xff] %vm3332_vm0, %v2473_v55  ;;  %963 = vperm.xlu1 %1939, %v2473_v55  }
 0x198   : > { %v859_v60 = vpop.xlane.xlu1 %858 }
 0x199   : > { %v2483_v61 = vmax.f32 %v2475_v56, %v859_v60  ;;  %v2529_v60 = vld [vmem:[#allocation2 + $0x68] sm:$0xff] }
 0x19a   : > { %3349 = vst [vmem:[#allocation11_spill] sm:$0xff] %v2529_v60 }
 0x19b   : > { %1486 = vst.msk [vmem:[#allocation2 + $0x40] sm:$0xff] %vm3332_vm0, %v2483_v61  ;;  %1003 = vperm.xlu1 %1939, %v2483_v61  }
 0x19c   : > { %v838_v7 = vpop.xlane.xlu1 %837  ;;  %v841_v10 = vpop.xlane.xlu0 %840 }
 0x19d   : > { %v2495_v11 = vmax.f32 %v2485_v62, %v838_v7  ;;  %v2498_v17 = vmax.f32 %v2487_v63, %v841_v10  ;;  %v762_v10 = vadd.s32 24, %v2275_v29 }
 0x19f   : > { %3344 = vst [vmem:[#allocation6_spill] sm:$0xff] %v2498_v17  ;;  %1479 = vst.msk [vmem:[#allocation2 + $0x8] sm:$0xff] %vm3332_vm0, %v2495_v11  ;;  %973 = vperm.xlu1 %1939, %v2498_v17   ;;  %v2553_v28 = vadd.s32 %v2283_v33, %v762_v10  ;;  %v2568_v10 = vld [vmem:[#allocation2 + $0x60] sm:$0xff] }
 0x1a0   : > { %1480 = vst.msk [vmem:[#allocation2 + $0x10] sm:$0xff] %vm3332_vm0, %v2498_v17  ;;  %v862_v31 = vpop.xlane.xlu1 %861  ;;  %v868_v42 = vpop.xlane.xlu0 %867  ;;  %3354 = vst [vmem:[#allocation16_spill] sm:$0xff] %v2568_v10 }
 0x1a1   : > { %v2514_v43 = vmax.f32 %v2500_v18, %v862_v31  ;;  %v2517_v44 = vmax.f32 %v2502_v22, %v868_v42  ;;  %v2535_v42 = vld [vmem:[#allocation2 + $0x18] sm:$0xff]  ;;  %vm805_vm13 = vcmp.ne.s32.totalorder %v2553_v28, %v2285_v34  ;;  %vm806_vm14 = vcmp.ne.s32.totalorder %v2553_v28, %v2297_v40  ;;  %v2595_v18 = vld [vmem:[#allocation2 + $0x30] sm:$0xff] }
 0x1a2   : > { %3350 = vst [vmem:[#allocation12_spill] sm:$0xff] %v2535_v42  ;;  %3358 = vst [vmem:[#allocation20_spill] sm:$0xff] %v2595_v18 }
 0x1a3   : > { %3347 = vst [vmem:[#allocation9_spill] sm:$0xff] %v2514_v43  ;;  %3348 = vst [vmem:[#allocation10_spill] sm:$0xff] %v2517_v44 }
 0x1a4   : > { %1487 = vst.msk [vmem:[#allocation2 + $0x48] sm:$0xff] %vm3332_vm0, %v2514_v43  ;;  %1489 = vst.msk [vmem:[#allocation2 + $0x58] sm:$0xff] %vm3332_vm0, %v2517_v44  ;;  %v865_v54 = vpop.xlane.xlu1 %864 }
 0x1a5   : > { %v2532_v7 = vmax.f32 %v2519_v45, %v865_v54 }
 0x1a6   : > { %v874_v31 = vpop.xlane.xlu0 %873 }
 0x1a7   : > { %1488 = vst.msk [vmem:[#allocation2 + $0x50] sm:$0xff] %vm3332_vm0, %v2532_v7  ;;  %v2542_v50 = vmax.f32 %v2529_v60, %v874_v31  ;;  %1013 = vperm.xlu1 %1939, %v2532_v7  }
 0x1a8   : > { %v844_v48 = vpop.xlane.xlu1 %843 }
 0x1a9   : > { %3351 = vst [vmem:[#allocation13_spill] sm:$0xff] %v2542_v50  ;;  %1491 = vst.msk [vmem:[#allocation2 + $0x68] sm:$0xff] %vm3332_vm0, %v2542_v50  ;;  %v2550_v23 = vmax.f32 %v2535_v42, %v844_v48  ;;  %v2585_v42 = vld [vmem:[#allocation2 + $0x28] sm:$0xff] }
 0x1aa   : > { %3356 = vst [vmem:[#allocation18_spill] sm:$0xff] %v2585_v42 }
 0x1ab   : > { %3352 = vst [vmem:[#allocation14_spill] sm:$0xff] %v2550_v23  ;;  %1481 = vst.msk [vmem:[#allocation2 + $0x18] sm:$0xff] %vm3332_vm0, %v2550_v23 }
 0x1ac   : > { %v847_v6 = vpop.xlane.xlu1 %846 }
 0x1ad   : > { %v2562_v54 = vmax.f32 %v2555_v58, %v847_v6 }
 0x1ae   : > { %v680_v48 = vpop.permute.xlu0 %679 }
 0x1af   : > { %3353 = vst [vmem:[#allocation15_spill] sm:$0xff] %v2562_v54  ;;  %1482 = vst.msk [vmem:[#allocation2 + $0x20] sm:$0xff] %vm3332_vm0, %v2562_v54  ;;  %vm731_vm15 = vcmp.eq.s32.totalorder %v680_v48, %v2288_v37  ;;  %vm732_vm2 = vcmp.eq.s32.totalorder %v680_v48, %v2294_v39  ;;  %983 = vperm.xlu1 %1939, %v2562_v54   ;;  %v2604_v54 = vld [vmem:[#allocation2 + $0x38] sm:$0xff] }
 0x1b0   : > { %vm1324_vm3 = vmand %vm731_vm15, %vm805_vm13  ;;  %v871_v6 = vpop.xlane.xlu1 %870  ;;  %3360 = vst [vmem:[#allocation22_spill] sm:$0xff] %v2604_v54 }
 0x1b1   : > { %vm1325_vm4 = vmand %vm732_vm2, %vm806_vm14  ;;  %v2581_v31 = vmax.f32 %v2568_v10, %v871_v6  ;;  %v1372_v60 = vsel %vm1324_vm3, %v2370_v4, 0.0 }
 0x1b2   : > { %v1373_v22 = vsel %vm1325_vm4, %v2378_v8, 0.0  ;;  %v2615_v8 = vld [vmem:[#allocation2 + $0x70] sm:$0xff] }
 0x1b3   : > { %3355 = vst [vmem:[#allocation17_spill] sm:$0xff] %v2581_v31  ;;  %1490 = vst.msk [vmem:[#allocation2 + $0x60] sm:$0xff] %vm3332_vm0, %v2581_v31  ;;  %1023 = vperm.xlu1 %1939, %v2581_v31   ;;  %v1407_v17 = vadd.f32 %v1373_v22, %v1372_v60 }
 0x1b4   : > { %v850_v63 = vpop.xlane.xlu1 %849  ;;  %3362 = vst [vmem:[#allocation24_spill] sm:$0xff] %v2615_v8 }
 0x1b5   : > { %1408 = vadd.xlane.f32.xlu0 %v1407_v17  ;;  %v2593_v6 = vmax.f32 %v2585_v42, %v850_v63  ;;  %v761_v63 = vadd.s32 16, %v2275_v29  ;;  %v763_v42 = vadd.s32 32, %v2275_v29 }
 0x1b7   : > { %3357 = vst [vmem:[#allocation19_spill] sm:$0xff] %v2593_v6  ;;  %1483 = vst.msk [vmem:[#allocation2 + $0x28] sm:$0xff] %vm3332_vm0, %v2593_v6  ;;  %v2622_v17 = vadd.s32 %v2283_v33, %v761_v63  ;;  %v2636_v63 = vadd.s32 %v2283_v33, %v763_v42 }
 0x1b8   : > { %v853_v48 = vpop.xlane.xlu1 %852 }
 0x1b9   : > { %v2602_v10 = vmax.f32 %v2595_v18, %v853_v48  ;;  %vm803_vm6 = vcmp.ne.s32.totalorder %v2622_v17, %v2285_v34  ;;  %vm804_vm7 = vcmp.ne.s32.totalorder %v2622_v17, %v2297_v40  ;;  %v657_v48 = vld [vmem:[%s2223_s30 + $0x28] sm:$0xff]  ;;  %vm807_vm12 = vcmp.ne.s32.totalorder %v2636_v63, %v2285_v34 }
 0x1ba   : > { %vm808_vm14 = vcmp.ne.s32.totalorder %v2636_v63, %v2297_v40  ;;  %v766_v63 = vadd.s32 56, %v2275_v29 }
 0x1bb   : > { %3359 = vst [vmem:[#allocation21_spill] sm:$0xff] %v2602_v10  ;;  %1484 = vst.msk [vmem:[#allocation2 + $0x30] sm:$0xff] %vm3332_vm0, %v2602_v10  ;;  %993 = vperm.xlu1 %1939, %v2602_v10  }
 0x1bc   : > { %v856_v22 = vpop.xlane.xlu1 %855 }
 0x1bd   : > { %v2613_v60 = vmax.f32 %v2604_v54, %v856_v22  ;;  %v659_v54 = vld [vmem:[%s2223_s30 + $0x38] sm:$0xff] }
 0x1bf   : > { %3361 = vst [vmem:[#allocation23_spill] sm:$0xff] %v2613_v60  ;;  %1485 = vst.msk [vmem:[#allocation2 + $0x38] sm:$0xff] %vm3332_vm0, %v2613_v60 }
 0x1c0   : > { %v877_v10 = vpop.xlane.xlu1 %876 }
 0x1c1   : > { %v2626_v18 = vmax.f32 %v2615_v8, %v877_v10  ;;  %v661_v8 = vld [vmem:[%s2223_s30 + $0x48] sm:$0xff] }
 0x1c3   : > { %3363 = vst [vmem:[#allocation25_spill] sm:$0xff] %v2626_v18  ;;  %1492 = vst.msk [vmem:[#allocation2 + $0x70] sm:$0xff] %vm3332_vm0, %v2626_v18  ;;  %1033 = vperm.xlu1 %1939, %v2626_v18  }
 0x1c4   : > { %v677_v10 = vpop.permute.xlu1 %676 }
 0x1c5   : > { %vm729_vm8 = vcmp.eq.s32.totalorder %v677_v10, %v2288_v37  ;;  %vm730_vm9 = vcmp.eq.s32.totalorder %v677_v10, %v2294_v39 }
 0x1c6   : > { %vm1322_vm10 = vmand %vm729_vm8, %vm803_vm6  ;;  %vm831_vm8 = vcmp.lt.s32.totalorder %v2285_v34, 16 }
 0x1c7   : > { %vm1323_vm11 = vmand %vm730_vm9, %vm804_vm7  ;;  %685 = vperm.xlu1 %1939, %v657_v48   ;;  %v1370_v42 = vsel %vm1322_vm10, %v2364_v1, 0.0 }
 0x1c8   : > { %v683_v22 = vpop.permute.xlu1 %682  ;;  %v1371_v10 = vsel %vm1323_vm11, %v2366_v2, 0.0  ;;  %vm2707_vm10 = vmand %vm803_vm6, %vm831_vm8 }
 0x1c9   : > { %vm733_vm15 = vcmp.eq.s32.totalorder %v683_v22, %v2288_v37  ;;  %vm734_vm2 = vcmp.eq.s32.totalorder %v683_v22, %v2294_v39  ;;  %v1404_v18 = vadd.f32 %v1371_v10, %v1370_v42  ;;  %v663_v22 = vld [vmem:[%s2223_s30 + $0x58] sm:$0xff]  ;;  %v665_v42 = vld [vmem:[%s2223_s30 + $0x68] sm:$0xff]  ;;  %vm2725_vm6 = vmand %vm807_vm12, %vm831_vm8 }
 0x1ca   : > { %vm1326_vm3 = vmand %vm733_vm15, %vm807_vm12  ;;  %v2668_v10 = vld [vmem:[#allocation2 + $0x78] sm:$0xff] }
 0x1cb   : > { %vm1327_vm4 = vmand %vm734_vm2, %vm808_vm14  ;;  %968 = vperm.xlu0 %1938, %v2495_v11   ;;  %691 = vperm.xlu1 %1939, %v659_v54   ;;  %v1374_v48 = vsel %vm1326_vm3, %v2388_v13, 0.0  ;;  %v667_v54 = vld [vmem:[%s2223_s30 + $0x78] sm:$0xff]  ;;  %3364 = vst [vmem:[#allocation26_spill] sm:$0xff] %v2668_v10 }
 0x1cc   : > { %v1375_v2 = vsel %vm1327_vm4, %v2392_v15, 0.0 }
 0x1cd   : > { %v1410_v31 = vadd.f32 %v1375_v2, %v1374_v48  ;;  %v1351_v48 = vld [vmem:[#allocation4 + $0x8] sm:$0xff] }
 0x1cf   : > { %978 = vperm.xlu0 %1938, %v2550_v23   ;;  %697 = vperm.xlu1 %1939, %v661_v8   ;;  %v666_v23 = vld [vmem:[%s2223_s30 + $0x70] sm:$0xff] }
 0x1d3   : > { %988 = vperm.xlu0 %1938, %v2593_v6   ;;  %703 = vperm.xlu1 %1939, %v663_v22   ;;  %v658_v6 = vld [vmem:[%s2223_s30 + $0x30] sm:$0xff] }
 0x1d7   : > { %1008 = vperm.xlu0 %1938, %v2514_v43   ;;  %709 = vperm.xlu1 %1939, %v665_v42  }
 0x1db   : > { %1018 = vperm.xlu0 %1938, %v2517_v44   ;;  %v880_v15 = vpop.xlane.xlu0 %879  ;;  %715 = vperm.xlu1 %1939, %v667_v54   ;;  %v660_v54 = vld [vmem:[%s2223_s30 + $0x40] sm:$0xff] }
 0x1dc   : > { %v2672_v8 = vmax.f32 %v2668_v10, %v880_v15  ;;  %v662_v15 = vld [vmem:[%s2223_s30 + $0x50] sm:$0xff]  ;;  %v664_v44 = vld [vmem:[%s2223_s30 + $0x60] sm:$0xff]  ;;  %v768_v10 = vadd.s32 72, %v2275_v29  ;;  %s3184_s30 = scalar_lea.vmem %s3308_s5, %s2211_s22 }
 0x1de   : > { %3365 = vst [vmem:[#allocation27_spill] sm:$0xff] %v2672_v8  ;;  %1493 = vst.msk [vmem:[#allocation2 + $0x78] sm:$0xff] %vm3332_vm0, %v2672_v8 }
 0x1df   : > { %1028 = vperm.xlu0 %1938, %v2542_v50   ;;  %v1403_v22 = vpop.xlane.xlu0 %1402 }
 0x1e0   : > { %v1447_v42 = vadd.f32 %v1403_v22, %v1351_v48 }
 0x1e2   : > { %1463 = vst.msk [vmem:[#allocation4 + $0x8] sm:$0xff] %vm3332_vm0, %v1447_v42  ;;  %v767_v42 = vadd.s32 64, %v2275_v29 }
 0x1e3   : > { %688 = vperm.xlu0 %1938, %v658_v6  }
 0x1e7   : > { %694 = vperm.xlu0 %1938, %v660_v54  }
 0x1eb   : > { %700 = vperm.xlu0 %1938, %v662_v15  }
 0x1ef   : > { %706 = vperm.xlu0 %1938, %v664_v44  }
 0x1f3   : > { %712 = vperm.xlu0 %1938, %v666_v23   ;;  %v2692_v23 = vadd.s32 %v2283_v33, %v767_v42 }
 0x1f5   : > { %vm815_vm7 = vcmp.ne.s32.totalorder %v2692_v23, %v2285_v34 }
 0x1f6   : > { %vm1157_vm9 = vmand %vm815_vm7, %vm831_vm8 }
 0x1f7   : > { %998 = vperm.xlu0 %1938, %v2613_v60  }
 0x1fb   : > { %1038 = vperm.xlu0 %1938, %v2672_v8  }
 0x1ff   : > { %1399 = vadd.xlane.f32.xlu1 %v2355_v59 }
 0x203   : > { %1405 = vadd.xlane.f32.xlu1 %v1404_v18 }
 0x207   : > { %1411 = vadd.xlane.f32.xlu1 %v1410_v31 }
 0x216   : > { %v964_v48 = vpop.permute.xlu1 %963 }
 0x21a   : > { %v1004_v22 = vpop.permute.xlu1 %1003 }
 0x21b   : > { %v1057_v6 = vsub.f32 %v2334_v47, %v1004_v22 }
 0x21d   : > { %v1105_v54 = vmul.f32 1.442695, %v1057_v6 }
 0x21e   : > { %v974_v15 = vpop.permute.xlu1 %973 }
 0x21f   : > { %1972 = vpow2.f32 %v1105_v54  ;;  %v1045_v44 = vsub.f32 %v2364_v1, %v974_v15 }
 0x221   : > { %v1081_v2 = vmul.f32 1.442695, %v1045_v44  ;;  %v1041_v44 = vsub.f32 %v2332_v46, %v964_v48  ;;  %v1353_v48 = vld [vmem:[#allocation4 + $0x18] sm:$0xff] }
 0x223   : > { %1974 = vpow2.f32 %v1081_v2  ;;  %v1073_v46 = vmul.f32 1.442695, %v1041_v44  ;;  %v2748_v44 = vadd.s32 %v2283_v33, %v766_v63 }
 0x225   : > { %vm814_vm4 = vcmp.ne.s32.totalorder %v2748_v44, %v2297_v40 }
 0x226   : > { %v1014_v18 = vpop.permute.xlu1 %1013 }
 0x229   : > { %v1973_v59 = vpop.eup %1972 }
 0x22a   : > { %v1221_v31 = vsel %vm1157_vm9, %v1973_v59, 0.0  ;;  %vm3333_vm9 = vcmp.ne.s32.totalorder %v2748_v44, %v2285_v34 }
 0x22b   : > { %1262 = vadd.xlane.f32.xlu1 %v1221_v31  ;;  %v764_v31 = vadd.s32 40, %v2275_v29 }
 0x22d   : > { %v2711_v2 = vpop.eup %1974 }
 0x22e   : > { %v984_v22 = vpop.permute.xlu1 %983 }
 0x22f   : > { %v1049_v42 = vsub.f32 %v2388_v13, %v984_v22  ;;  %v770_v22 = vadd.s32 88, %v2275_v29 }
 0x231   : > { %v1089_v54 = vmul.f32 1.442695, %v1049_v42  ;;  %v2738_v42 = vadd.s32 %v2283_v33, %v764_v31 }
 0x232   : > { %v2717_v15 = vpop.permute.xlu1 %1023 }
 0x233   : > { %1976 = vpow2.f32 %v1089_v54  ;;  %vm3334_vm11 = vcmp.ne.s32.totalorder %v2738_v42, %v2285_v34  ;;  %vm810_vm12 = vcmp.ne.s32.totalorder %v2738_v42, %v2297_v40 }
 0x234   : > { %1978 = vpow2.f32 %v1073_v46  ;;  %v1061_v46 = vsub.f32 %v2362_v0, %v1014_v18 }
 0x23a   : > { %v2732_v13 = vpop.permute.xlu1 %993 }
 0x23d   : > { %v2729_v59 = vpop.eup %1976 }
 0x242   : > { %v1409_v54 = vpop.xlane.xlu0 %1408  ;;  %v2741_v6 = vpop.permute.xlu1 %1033 }
 0x243   : > { %v1449_v8 = vadd.f32 %v1409_v54, %v1353_v48  ;;  %v1069_v41 = vsub.f32 %v2412_v25, %v2741_v6 }
 0x245   : > { %1465 = vst.msk [vmem:[#allocation4 + $0x18] sm:$0xff] %vm3332_vm0, %v1449_v8  ;;  %v2759_v8 = vadd.s32 %v2283_v33, %v768_v10 }
 0x246   : > { %v686_v31 = vpop.permute.xlu1 %685 }
 0x247   : > { %vm735_vm14 = vcmp.eq.s32.totalorder %v686_v31, %v2288_v37  ;;  %vm736_vm15 = vcmp.eq.s32.totalorder %v686_v31, %v2294_v39  ;;  %v2767_v31 = vadd.s32 %v2283_v33, %v770_v22  ;;  %v1053_v22 = vsub.f32 %v2410_v24, %v2732_v13 }
 0x248   : > { %vm1328_vm2 = vmand %vm735_vm14, %vm3334_vm11 }
 0x249   : > { %vm1329_vm3 = vmand %vm736_vm15, %vm810_vm12  ;;  %v1376_v48 = vsel %vm1328_vm2, %v2400_v19, 0.0 }
 0x24a   : > { %v969_v63 = vpop.permute.xlu0 %968  ;;  %v692_v54 = vpop.permute.xlu1 %691  ;;  %v1377_v60 = vsel %vm1329_vm3, %v2404_v21, 0.0  ;;  %vm2779_vm15 = vmand %vm799_vm1, %vm831_vm8  ;;  %vm818_vm3 = vcmp.ne.s32.totalorder %v2759_v8, %v2297_v40 }
 0x24b   : > { %v1043_v10 = vsub.f32 %v2343_v52, %v969_v63  ;;  %vm739_vm14 = vcmp.eq.s32.totalorder %v692_v54, %v2288_v37  ;;  %vm740_vm12 = vcmp.eq.s32.totalorder %v692_v54, %v2294_v39  ;;  %v1413_v18 = vadd.f32 %v1377_v60, %v1376_v48  ;;  %v1979_v52 = vpop.eup %1978 }
 0x24c   : > { %vm2783_vm2 = vmand %vm740_vm12, %vm814_vm4  ;;  %v1113_v63 = vmul.f32 1.442695, %v1061_v46  ;;  %v772_v60 = vadd.s32 104, %v2275_v29  ;;  %vm822_vm4 = vcmp.ne.s32.totalorder %v2767_v31, %v2297_v40  ;;  %v769_v46 = vadd.s32 80, %v2275_v29 }
 0x24d   : > { %v1077_v54 = vmul.f32 1.442695, %v1043_v10  ;;  %1414 = vadd.xlane.f32.xlu0 %v1413_v18  ;;  %vm2793_vm1 = vmand %vm739_vm14, %vm3333_vm9  ;;  %v1381_v48 = vsel %vm2783_vm2, %v2426_v35, 0.0  ;;  %vm817_vm12 = vcmp.ne.s32.totalorder %v2759_v8, %v2285_v34  ;;  %v1065_v35 = vsub.f32 %v2386_v12, %v2717_v15 }
 0x24e   : > { %v979_v50 = vpop.permute.xlu0 %978  ;;  %v698_v43 = vpop.permute.xlu1 %697  ;;  %v1380_v10 = vsel %vm2793_vm1, %v2420_v30, 0.0  ;;  %v1205_v38 = vsel %vm2779_vm15, %v1979_v52, 0.0  ;;  %vm821_vm15 = vcmp.ne.s32.totalorder %v2767_v31, %v2285_v34 }
 0x24f   : > { %1980 = vpow2.f32 %v1077_v54  ;;  %v1047_v18 = vsub.f32 %v2370_v4, %v979_v50  ;;  %vm743_vm14 = vcmp.eq.s32.totalorder %v698_v43, %v2288_v37  ;;  %vm744_vm2 = vcmp.eq.s32.totalorder %v698_v43, %v2294_v39 }
 0x250   : > { %vm2816_vm0 = vmand %vm744_vm2, %vm818_vm3  ;;  %v774_v54 = vadd.s32 120, %v2275_v29  ;;  %v2823_v4 = vadd.f32 %v1381_v48, %v1380_v10  ;;  %1982 = vpow2.f32 %v1113_v63  ;;  %v2826_v43 = vadd.s32 %v2283_v33, %v772_v60 }
 0x251   : > { %v1085_v50 = vmul.f32 1.442695, %v1047_v18  ;;  %1238 = vadd.xlane.f32.xlu0 %v1205_v38  ;;  %vm1336_vm3 = vmand %vm743_vm14, %vm817_vm12  ;;  %v1385_v15 = vsel %vm2816_vm0, %v2350_v57, 0.0  ;;  %v2842_v60 = vadd.s32 %v2283_v33, %v769_v46  ;;  %v1121_v48 = vmul.f32 1.442695, %v1065_v35 }
 0x252   : > { %v2834_v21 = vpop.permute.xlu0 %988  ;;  %v704_v52 = vpop.permute.xlu1 %703  ;;  %v1384_v63 = vsel %vm1336_vm3, %v2345_v53, 0.0  ;;  %v2852_v10 = vadd.s32 %v2283_v33, %v774_v54  ;;  %vm826_vm14 = vcmp.ne.s32.totalorder %v2826_v43, %v2297_v40  ;;  %v771_v54 = vadd.s32 96, %v2275_v29 }
 0x253   : > { %1984 = vpow2.f32 %v1085_v50  ;;  %vm747_vm1 = vcmp.eq.s32.totalorder %v704_v52, %v2288_v37  ;;  %vm748_vm2 = vcmp.eq.s32.totalorder %v704_v52, %v2294_v39  ;;  %v2854_v18 = vadd.f32 %v1385_v15, %v1384_v63 }
 0x254   : > { %vm2847_vm0 = vmand %vm748_vm2, %vm822_vm4  ;;  %vm3335_vm4 = vcmp.ne.s32.totalorder %v2826_v43, %v2285_v34  ;;  %1986 = vpow2.f32 %v1121_v48  ;;  %vm830_vm11 = vcmp.ne.s32.totalorder %v2852_v10, %v2297_v40  ;;  %v1097_v63 = vmul.f32 1.442695, %v1053_v22 }
 0x255   : > { %vm1340_vm3 = vmand %vm747_vm1, %vm821_vm15  ;;  %v1389_v46 = vsel %vm2847_vm0, %v2380_v9, 0.0  ;;  %vm819_vm0 = vcmp.ne.s32.totalorder %v2842_v60, %v2285_v34  ;;  %v765_v9 = vadd.s32 48, %v2275_v29 }
 0x256   : > { %v1009_v35 = vpop.permute.xlu0 %1008  ;;  %v710_v38 = vpop.permute.xlu1 %709  ;;  %v1388_v13 = vsel %vm1340_vm3, %v2372_v5, 0.0  ;;  %vm2878_vm1 = vmand %vm801_vm5, %vm831_vm8 }
 0x257   : > { %v1059_v50 = vsub.f32 %v2345_v53, %v1009_v35  ;;  %vm751_vm2 = vcmp.eq.s32.totalorder %v710_v38, %v2288_v37  ;;  %vm752_vm9 = vcmp.eq.s32.totalorder %v710_v38, %v2294_v39  ;;  %v2890_v53 = vadd.f32 %v1389_v46, %v1388_v13 }
 0x258   : > { %vm2884_vm3 = vmand %vm752_vm9, %vm826_vm14  ;;  %v2916_v13 = vadd.s32 %v2283_v33, %v771_v54  ;;  %vm3336_vm14 = vcmp.ne.s32.totalorder %v2852_v10, %v2285_v34 }
 0x259   : > { %v1981_v52 = vpop.eup %1980  ;;  %v1109_v57 = vmul.f32 1.442695, %v1059_v50  ;;  %vm2897_vm5 = vmand %vm751_vm2, %vm3335_vm4  ;;  %v1393_v35 = vsel %vm2884_vm3, %v2402_v20, 0.0 }
 0x25a   : > { %v1019_v38 = vpop.permute.xlu0 %1018  ;;  %v1207_v46 = vsel %vm2878_vm1, %v1981_v52, 0.0  ;;  %v716_v22 = vpop.permute.xlu1 %715  ;;  %vm2911_vm9 = vmand %vm819_vm0, %vm831_vm8  ;;  %v1392_v20 = vsel %vm2897_vm5, %v2394_v16, 0.0 }
 0x25b   : > { %v1983_v50 = vpop.eup %1982  ;;  %1988 = vpow2.f32 %v1109_v57  ;;  %1241 = vadd.xlane.f32.xlu1 %v1207_v46  ;;  %vm755_vm2 = vcmp.eq.s32.totalorder %v716_v22, %v2288_v37  ;;  %vm756_vm1 = vcmp.eq.s32.totalorder %v716_v22, %v2294_v39  ;;  %vm2931_vm3 = vmand %vm805_vm13, %vm831_vm8  ;;  %v2938_v15 = vadd.f32 %v1393_v35, %v1392_v20 }
 0x25c   : > { %vm1349_vm5 = vmand %vm756_vm1, %vm830_vm11  ;;  %1990 = vpow2.f32 %v1097_v63  ;;  %v1129_v57 = vmul.f32 1.442695, %v1069_v41  ;;  %v1063_v48 = vsub.f32 %v2372_v5, %v1019_v38  ;;  %v1225_v22 = vsel %vm2911_vm9, %v1983_v50, 0.0 }
 0x25d   : > { %v2940_v52 = vpop.eup %1984  ;;  %vm1348_vm4 = vmand %vm755_vm2, %vm3336_vm14  ;;  %v1397_v28 = vsel %vm1349_vm5, %v2428_v36, 0.0  ;;  %v782_v63 = vadd.s32 %v2283_v33, %v765_v9  ;;  %vm823_vm13 = vcmp.ne.s32.totalorder %v2916_v13, %v2285_v34  ;;  %v773_v36 = vadd.s32 112, %v2275_v29 }
 0x25e   : > { %v1029_v46 = vpop.permute.xlu0 %1028  ;;  %v1211_v35 = vsel %vm2931_vm3, %v2940_v52, 0.0  ;;  %v1396_v20 = vsel %vm1348_vm4, %v2424_v32, 0.0  ;;  %1992 = vpow2.f32 %v1129_v57  ;;  %v1051_v41 = vsub.f32 %v2400_v19, %v2834_v21  ;;  %v1987_v6 = vpop.eup %1986  ;;  %vm2967_vm4 = vmand %vm823_vm13, %vm831_vm8 }
 0x25f   : > { %1268 = vadd.xlane.f32.xlu1 %v1225_v22  ;;  %v2956_v5 = vadd.f32 %v1397_v28, %v1396_v20  ;;  %v1117_v38 = vmul.f32 1.442695, %v1063_v48  ;;  %vm812_vm11 = vcmp.ne.s32.totalorder %v782_v63, %v2297_v40  ;;  %v3392_v29 = vsel %vm2725_vm6, %v2729_v59, 0.0  ;;  %vm2982_vm1 = vmand %vm817_vm12, %vm831_vm8 }
 0x260   : > { %vm811_vm14 = vcmp.ne.s32.totalorder %v782_v63, %v2285_v34  ;;  %v2992_v17 = vadd.s32 %v2283_v33, %v773_v36  ;;  %v1093_v57 = vmul.f32 1.442695, %v1051_v41  ;;  %v1067_v48 = vsub.f32 %v2394_v16, %v1029_v46 }
 0x261   : > { %1994 = vpow2.f32 %v1117_v38  ;;  %vm816_vm12 = vcmp.ne.s32.totalorder %v2692_v23, %v2297_v40  ;;  %v1229_v33 = vsel %vm2967_vm4, %v1987_v6, 0.0  ;;  %v3399_v23 = vsel %vm2707_vm10, %v2711_v2, 0.0 }
 0x262   : > { %v689_v50 = vpop.permute.xlu0 %688  ;;  %1996 = vpow2.f32 %v1093_v57 }
 0x263   : > { %vm737_vm9 = vcmp.eq.s32.totalorder %v689_v50, %v2288_v37  ;;  %vm738_vm2 = vcmp.eq.s32.totalorder %v689_v50, %v2294_v39  ;;  %1250 = vadd.xlane.f32.xlu1 %v3392_v29 }
 0x264   : > { %vm2986_vm5 = vmand %vm738_vm2, %vm812_vm11 }
 0x265   : > { %v1989_v59 = vpop.eup %1988  ;;  %vm1330_vm6 = vmand %vm737_vm9, %vm811_vm14  ;;  %v1379_v8 = vsel %vm2986_vm5, %v2414_v26, 0.0 }
 0x266   : > { %v695_v28 = vpop.permute.xlu0 %694  ;;  %v1223_v22 = vsel %vm2982_vm1, %v1989_v59, 0.0  ;;  %v1378_v20 = vsel %vm1330_vm6, %v2410_v24, 0.0  ;;  %v1991_v16 = vpop.eup %1990  ;;  %vm1153_vm2 = vmand %vm811_vm14, %vm831_vm8  ;;  %vm827_vm1 = vcmp.ne.s32.totalorder %v2992_v17, %v2285_v34  ;;  %v1125_v24 = vmul.f32 1.442695, %v1067_v48  ;;  %v1350_v59 = vld [vmem:[#allocation4] sm:$0xff] }
 0x267   : > { %vm741_vm11 = vcmp.eq.s32.totalorder %v695_v28, %v2288_v37  ;;  %vm742_vm9 = vcmp.eq.s32.totalorder %v695_v28, %v2294_v39  ;;  %1274 = vadd.xlane.f32.xlu1 %v1229_v33  ;;  %1265 = vadd.xlane.f32.xlu0 %v1223_v22  ;;  %v1416_v26 = vadd.f32 %v1379_v8, %v1378_v20  ;;  %v1217_v41 = vsel %vm1153_vm2, %v1991_v16, 0.0  ;;  %v1352_v8 = vld [vmem:[#allocation4 + $0x10] sm:$0xff]  ;;  %v1354_v33 = vld [vmem:[#allocation4 + $0x20] sm:$0xff] }
 0x268   : > { %vm3016_vm4 = vmand %vm741_vm11, %vm815_vm7  ;;  %vm820_vm14 = vcmp.ne.s32.totalorder %v2842_v60, %v2297_v40  ;;  %v1993_v6 = vpop.eup %1992  ;;  %1998 = vpow2.f32 %v1125_v24  ;;  %vm824_vm2 = vcmp.ne.s32.totalorder %v2916_v13, %v2297_v40  ;;  %v1181_v16 = vld [vmem:[#allocation3 + $0x40] sm:$0xff]  ;;  %v3409_v24 = vsub.f32 %v2470_v51, %v2473_v55  ;;  %v3413_v51 = vld [vmem:[#allocation15_spill] sm:$0xff] }
 0x269   : > { %vm1335_vm5 = vmand %vm742_vm9, %vm816_vm12  ;;  %v1382_v63 = vsel %vm3016_vm4, %v2334_v47, 0.0  ;;  %v3414_v55 = vsub.f32 %v2555_v58, %v3413_v51 }
 0x26a   : > { %v701_v36 = vpop.permute.xlu0 %700  ;;  %v1383_v38 = vsel %vm1335_vm5, %v2336_v49, 0.0  ;;  %vm1169_vm12 = vmand %vm827_vm1, %vm831_vm8 }
 0x26b   : > { %vm745_vm7 = vcmp.eq.s32.totalorder %v701_v36, %v2288_v37  ;;  %vm746_vm6 = vcmp.eq.s32.totalorder %v701_v36, %v2294_v39  ;;  %1256 = vadd.xlane.f32.xlu1 %v1217_v41  ;;  %1244 = vadd.xlane.f32.xlu0 %v3399_v23  ;;  %v1422_v47 = vadd.f32 %v1383_v38, %v1382_v63  ;;  %v1233_v2 = vsel %vm1169_vm12, %v1993_v6, 0.0  ;;  %v1995_v9 = vpop.eup %1994  ;;  %v1355_v63 = vld [vmem:[#allocation4 + $0x28] sm:$0xff]  ;;  %v1173_v38 = vld [vmem:[#allocation3] sm:$0xff] }
 0x26c   : > { %vm1338_vm11 = vmand %vm745_vm7, %vm819_vm0  ;;  %vm828_vm7 = vcmp.ne.s32.totalorder %v2992_v17, %v2297_v40 }
 0x26d   : > { %vm1339_vm9 = vmand %vm746_vm6, %vm820_vm14  ;;  %v1386_v49 = vsel %vm1338_vm11, %v2362_v0, 0.0 }
 0x26e   : > { %v707_v1 = vpop.permute.xlu0 %706  ;;  %v1387_v50 = vsel %vm1339_vm9, %v2368_v3, 0.0  ;;  %vm1163_vm0 = vmand %vm821_vm15, %vm831_vm8  ;;  %vm3401_vm9 = vcmp.ne.s32.totalorder %v2826_v43, %v2285_v34 }
 0x26f   : > { %vm749_vm10 = vcmp.eq.s32.totalorder %v707_v1, %v2288_v37  ;;  %vm750_vm4 = vcmp.eq.s32.totalorder %v707_v1, %v2294_v39  ;;  %1280 = vadd.xlane.f32.xlu1 %v1233_v2  ;;  %1247 = vadd.xlane.f32.xlu0 %v1211_v35  ;;  %v1428_v0 = vadd.f32 %v1387_v50, %v1386_v49  ;;  %v1227_v54 = vsel %vm1163_vm0, %v1995_v9, 0.0  ;;  %v1997_v35 = vpop.eup %1996  ;;  %v3415_v49 = vld [vmem:[#allocation7_spill] sm:$0xff]  ;;  %v3416_v1 = vld [vmem:[#allocation9_spill] sm:$0xff] }
 0x270   : > { %vm1342_vm5 = vmand %vm749_vm10, %vm823_vm13  ;;  %vm3400_vm13 = vcmp.ne.s32.totalorder %v2738_v42, %v2285_v34  ;;  %v3417_v2 = vsub.f32 %v3415_v49, %v3416_v1 }
 0x271   : > { %vm1343_vm14 = vmand %vm750_vm4, %vm824_vm2  ;;  %v1390_v3 = vsel %vm1342_vm5, %v2386_v12, 0.0  ;;  %vm3403_vm4 = vcmp.ne.s32.totalorder %v2852_v10, %v2285_v34  ;;  %vm3404_vm5 = vcmask 7168  }
 0x272   : > { %v713_v60 = vpop.permute.xlu0 %712  ;;  %v1391_v52 = vsel %vm1343_vm14, %v2390_v14, 0.0  ;;  %vm1151_vm6 = vmand %vm3400_vm13, %vm831_vm8  ;;  %v1999_v31 = vpop.eup %1998  ;;  %v947_v50 = vmul.f32 1.442695, %v3417_v2  ;;  %v1175_v2 = vld [vmem:[#allocation3 + $0x10] sm:$0xff] }
 0x273   : > { %vm753_vm3 = vcmp.eq.s32.totalorder %v713_v60, %v2288_v37  ;;  %vm754_vm15 = vcmp.eq.s32.totalorder %v713_v60, %v2294_v39  ;;  %1417 = vadd.xlane.f32.xlu1 %v1416_v26  ;;  %1271 = vadd.xlane.f32.xlu0 %v1227_v54  ;;  %v1434_v12 = vadd.f32 %v1391_v52, %v1390_v3  ;;  %v1215_v37 = vsel %vm1151_vm6, %v1997_v35, 0.0  ;;  %vm1167_vm2 = vmand %vm3401_vm9, %vm831_vm8  ;;  %v1174_v60 = vld [vmem:[#allocation3 + $0x8] sm:$0xff]  ;;  %v3422_v54 = vld [vmem:[#allocation5_spill] sm:$0xff] }
 0x274   : > { %vm1346_vm12 = vmand %vm753_vm3, %vm827_vm1  ;;  %v1231_v21 = vsel %vm1167_vm2, %v1999_v31, 0.0  ;;  %vm3402_vm1 = vcmp.ne.s32.totalorder %v2748_v44, %v2285_v34  ;;  %v3423_v52 = vld [vmem:[#allocation6_spill] sm:$0xff] }
 0x275   : > { %vm1347_vm11 = vmand %vm754_vm15, %vm828_vm7  ;;  %v1394_v40 = vsel %vm1346_vm12, %v2412_v25, 0.0  ;;  %v3424_v58 = vsub.f32 %v3422_v54, %v3423_v52 }
 0x276   : > { %v999_v14 = vpop.permute.xlu0 %998  ;;  %v1395_v39 = vsel %vm1347_vm11, %v2416_v27, 0.0  ;;  %vm1155_vm10 = vmand %vm3402_vm1, %vm831_vm8 }
 0x277   : > { %v1055_v13 = vsub.f32 %v2420_v30, %v999_v14  ;;  %1423 = vadd.xlane.f32.xlu1 %v1422_v47  ;;  %1253 = vadd.xlane.f32.xlu0 %v1215_v37  ;;  %v1440_v42 = vadd.f32 %v1395_v39, %v1394_v40  ;;  %vm1171_vm0 = vmand %vm3403_vm4, %vm831_vm8  ;;  %v937_v47 = vmul.f32 1.442695, %v3414_v55  ;;  %v933_v35 = vmul.f32 1.442695, %v3424_v58  ;;  %v3426_v40 = vld [vmem:[#allocation21_spill] sm:$0xff] }
 0x278   : > { %vm3405_vm14 = vmmov %vm3404_vm5 }
 0x279   : > { %v1101_v29 = vmul.f32 1.442695, %v1055_v13  ;;  %vm3406_vm8 = vmmov %vm3404_vm5 }
 0x27a   : > { %v1039_v19 = vpop.permute.xlu0 %1038  ;;  %vm3408_vm7 = vmmov %vm3404_vm5 }
 0x27b   : > { %2000 = vpow2.f32 %v1101_v29  ;;  %v1071_v25 = vsub.f32 %v2424_v32, %v1039_v19  ;;  %1429 = vadd.xlane.f32.xlu1 %v1428_v0  ;;  %1277 = vadd.xlane.f32.xlu0 %v1231_v21  ;;  %vm3412_vm3 = vmmov %vm3404_vm5  ;;  %v1183_v29 = vld [vmem:[#allocation3 + $0x50] sm:$0xff]  ;;  %v3428_v19 = vld [vmem:[#allocation12_spill] sm:$0xff] }
 0x27c   : > { %vm3418_vm15 = vmmov %vm3412_vm3  ;;  %v3429_v21 = vld [vmem:[#allocation14_spill] sm:$0xff] }
 0x27d   : > { %v1133_v27 = vmul.f32 1.442695, %v1071_v25  ;;  %v3430_v25 = vsub.f32 %v3428_v19, %v3429_v21  ;;  %vm3434_vm13 = vmmov %vm3412_vm3  ;;  %v1176_v19 = vld [vmem:[#allocation3 + $0x18] sm:$0xff]  ;;  %v1187_v21 = vld [vmem:[#allocation3 + $0x70] sm:$0xff] }
 0x27e   : > { %vm3438_vm6 = vmmov %vm3412_vm3 }
 0x27f   : > { %2002 = vpow2.f32 %v1133_v27  ;;  %1435 = vadd.xlane.f32.xlu1 %v1434_v12  ;;  %v3425_v12 = vld [vmem:[#allocation20_spill] sm:$0xff]  ;;  %v935_v27 = vmul.f32 1.442695, %v3430_v25  ;;  %vm3442_vm12 = vmmov %vm3412_vm3 }
 0x280   : > { %v3427_v14 = vsub.f32 %v3425_v12, %v3426_v40  ;;  %v1593_v40 = vld [vmem:[#allocation2] sm:$0xff]  ;;  %vm3446_vm11 = vmmov %vm3412_vm3 }
 0x281   : > { %vm3447_vm9 = vmmov %vm3412_vm3 }
 0x282   : > { %v941_v37 = vmul.f32 1.442695, %v3427_v14  ;;  %vm3448_vm2 = vmmov %vm3412_vm3 }
 0x283   : > { %1441 = vadd.xlane.f32.xlu1 %v1440_v42  ;;  %vm3449_vm1 = vmmov %vm3448_vm2 }
 0x284   : > { %vm3457_vm4 = vmmov %vm3449_vm1 }
 0x285   : > { %v2001_v30 = vpop.eup %2000 }
 0x286   : > { %v1219_v43 = vsel %vm1155_vm10, %v2001_v30, 0.0  ;;  %vm3456_vm10 = vmmov %vm3449_vm1 }
 0x287   : > { %1259 = vadd.xlane.f32.xlu0 %v1219_v43 }
 0x289   : > { %v2003_v32 = vpop.eup %2002 }
 0x28a   : > { %v1235_v17 = vsel %vm1171_vm0, %v2003_v32, 0.0  ;;  %v3431_v32 = vld [vmem:[#allocation24_spill] sm:$0xff]  ;;  %vm3458_vm0 = vmmov %vm3449_vm1 }
 0x28b   : > { %1283 = vadd.xlane.f32.xlu0 %v1235_v17  ;;  %v3432_v17 = vld [vmem:[#allocation25_spill] sm:$0xff] }
 0x28c   : > { %v1400_v57 = vpop.xlane.xlu1 %1399 }
 0x28d   : > { %v1446_v48 = vadd.f32 %v1400_v57, %v1350_v59  ;;  %v3433_v59 = vsub.f32 %v3431_v32, %v3432_v17 }
 0x28f   : > { %1462 = vst.msk [vmem:[#allocation4] sm:$0xff] %vm3404_vm5, %v1446_v48  ;;  %1420 = vadd.xlane.f32.xlu0 %v2823_v4  ;;  %v3407_v4 = vsub.f32 %v2475_v56, %v2483_v61  ;;  %v3411_v61 = vsub.f32 %v2519_v45, %v2532_v7  ;;  %v3419_v45 = vld [vmem:[#allocation16_spill] sm:$0xff]  ;;  %v3420_v7 = vld [vmem:[#allocation17_spill] sm:$0xff]  ;;  %v957_v57 = vmul.f32 1.442695, %v3433_v59  ;;  %vm3459_vm5 = vmmov %vm3458_vm0 }
 0x290   : > { %v1406_v44 = vpop.xlane.xlu1 %1405  ;;  %v3421_v9 = vsub.f32 %v3419_v45, %v3420_v7  ;;  %v3147_v48 = vld [vmem:[%s3138_s27] sm:$0xff]  ;;  %v3443_v7 = vld [vmem:[#allocation11_spill] sm:$0xff] }
 0x291   : > { %v1448_v28 = vadd.f32 %v1406_v44, %v1352_v8  ;;  %v945_v22 = vmul.f32 1.442695, %v3407_v4  ;;  %v949_v36 = vmul.f32 1.442695, %v3411_v61  ;;  %v3435_v4 = vld [vmem:[#allocation8_spill] sm:$0xff]  ;;  %v3440_v61 = vld [vmem:[#allocation19_spill] sm:$0xff] }
 0x292   : > { %v953_v0 = vmul.f32 1.442695, %v3421_v9  ;;  %v3444_v9 = vld [vmem:[#allocation13_spill] sm:$0xff] }
 0x293   : > { %1464 = vst.msk [vmem:[#allocation4 + $0x10] sm:$0xff] %vm3405_vm14, %v1448_v28  ;;  %1426 = vadd.xlane.f32.xlu0 %v2854_v18  ;;  %2004 = vpow2.f32 %v945_v22  ;;  %v3436_v22 = vld [vmem:[#allocation10_spill] sm:$0xff]  ;;  %vm3460_vm14 = vmmov %vm3458_vm0 }
 0x294   : > { %v1412_v34 = vpop.xlane.xlu1 %1411 }
 0x295   : > { %v1450_v10 = vadd.f32 %v1412_v34, %v1354_v33  ;;  %v1177_v33 = vld [vmem:[#allocation3 + $0x20] sm:$0xff]  ;;  %v1657_v34 = vadd.f32 1e-05, %v3147_v48 }
 0x296   : > { %v1577_v17 = vld [vmem:[#allocation4] sm:$0xff] }
 0x297   : > { %1466 = vst.msk [vmem:[#allocation4 + $0x20] sm:$0xff] %vm3406_vm8, %v1450_v10  ;;  %1432 = vadd.xlane.f32.xlu0 %v2890_v53  ;;  %v929_v53 = vmul.f32 1.442695, %v3409_v24  ;;  %vm3461_vm8 = vmmov %vm3458_vm0 }
 0x299   : > { %2006 = vpow2.f32 %v929_v53  ;;  %v1182_v53 = vld [vmem:[#allocation3 + $0x48] sm:$0xff] }
 0x29b   : > { %1438 = vadd.xlane.f32.xlu0 %v2938_v15  ;;  %v3410_v15 = vsub.f32 %v2485_v62, %v2495_v11 }
 0x29d   : > { %v2005_v20 = vpop.eup %2004 }
 0x29e   : > { %v1197_v26 = vmul.f32 %v2005_v20, %v1181_v16  ;;  %v3437_v20 = vsub.f32 %v3435_v4, %v3436_v22 }
 0x29f   : > { %1444 = vadd.xlane.f32.xlu0 %v2956_v5  ;;  %v931_v5 = vmul.f32 1.442695, %v3410_v15  ;;  %v1185_v15 = vld [vmem:[#allocation3 + $0x60] sm:$0xff] }
 0x2a0   : > { %v951_v16 = vmul.f32 1.442695, %v3437_v20 }
 0x2a1   : > { %2008 = vpow2.f32 %v931_v5 }
 0x2a2   : > { %2010 = vpow2.f32 %v949_v36 }
 0x2a3   : > { %v2007_v56 = vpop.eup %2006  ;;  %2012 = vpow2.f32 %v937_v47 }
 0x2a4   : > { %v1189_v23 = vmul.f32 %v2007_v56, %v1173_v38  ;;  %2014 = vpow2.f32 %v947_v50  ;;  %v3439_v56 = vld [vmem:[#allocation18_spill] sm:$0xff]  ;;  %v1179_v50 = vld [vmem:[#allocation3 + $0x30] sm:$0xff] }
 0x2a5   : > { %2016 = vpow2.f32 %v953_v0  ;;  %v3441_v36 = vsub.f32 %v3439_v56, %v3440_v61  ;;  %v3445_v0 = vsub.f32 %v3443_v7, %v3444_v9  ;;  %v1356_v56 = vld [vmem:[#allocation4 + $0x30] sm:$0xff] }
 0x2a6   : > { %2018 = vpow2.f32 %v933_v35 }
 0x2a7   : > { %2020 = vpow2.f32 %v941_v37 }
 0x2ab   : > { %v2009_v3 = vpop.eup %2008 }
 0x2ac   : > { %v1190_v39 = vmul.f32 %v2009_v3, %v1174_v60  ;;  %v2011_v31 = vpop.eup %2010  ;;  %v955_v3 = vmul.f32 1.442695, %v3445_v0 }
 0x2ad   : > { %v1199_v8 = vmul.f32 %v2011_v31, %v1183_v29  ;;  %v2013_v44 = vpop.eup %2012 }
 0x2b8   : > { %v1263_v46 = vpop.xlane.xlu1 %1262 }
 0x2b9   : > { %v1293_v18 = vadd.f32 %v1263_v46, %v1197_v26  ;;  %v2015_v26 = vpop.eup %2014  ;;  %v1193_v46 = vmul.f32 %v2013_v44, %v1177_v33  ;;  %v3451_v33 = vld [vmem:[#allocation23_spill] sm:$0xff] }
 0x2ba   : > { %v1198_v55 = vmul.f32 %v2015_v26, %v1182_v53  ;;  %v3453_v26 = vld [vmem:[#allocation26_spill] sm:$0xff] }
 0x2bb   : > { %1310 = vst.msk [vmem:[#allocation3 + $0x40] sm:$0xff] %vm3408_vm7, %v1293_v18  ;;  %v2017_v18 = vpop.eup %2016  ;;  %vm3462_vm7 = vmmov %vm3458_vm0 }
 0x2bc   : > { %v1201_v47 = vmul.f32 %v2017_v18, %v1185_v15 }
 0x2c2   : > { %v1521_v5 = vld [vmem:[#allocation3 + $0x40] sm:$0xff] }
 0x2da   : > { %v1415_v41 = vpop.xlane.xlu0 %1414 }
 0x2db   : > { %v1451_v6 = vadd.f32 %v1415_v41, %v1355_v63  ;;  %v939_v41 = vmul.f32 1.442695, %v3441_v36 }
 0x2dd   : > { %1467 = vst.msk [vmem:[#allocation4 + $0x28] sm:$0xff] %vm3412_vm3, %v1451_v6  ;;  %v2019_v6 = vpop.eup %2018  ;;  %vm3463_vm3 = vmmov %vm3458_vm0 }
 0x2de   : > { %v1239_v62 = vpop.xlane.xlu0 %1238  ;;  %v1191_v37 = vmul.f32 %v2019_v6, %v1175_v2  ;;  %v3190_v6 = vld [vmem:[%s3138_s27 + $0x40] sm:$0xff] }
 0x2df   : > { %v1285_v11 = vadd.f32 %v1239_v62, %v1189_v23  ;;  %v3159_v23 = vld [vmem:[%s3138_s27 + $0x8] sm:$0xff]  ;;  %v2021_v62 = vpop.eup %2020  ;;  %v1665_v2 = vadd.f32 1e-05, %v3190_v6 }
 0x2e0   : > { %v1658_v58 = vadd.f32 1e-05, %v3159_v23 }
 0x2e1   : > { %1302 = vst.msk [vmem:[#allocation3] sm:$0xff] %vm3418_vm15, %v1285_v11  ;;  %v1537_v11 = vadd.f32 1e-05, %v1521_v5  ;;  %vm3464_vm15 = vmmov %vm3458_vm0 }
 0x2e8   : > { %v1513_v13 = vld [vmem:[#allocation3] sm:$0xff]  ;;  %v1242_v42 = vpop.xlane.xlu1 %1241 }
 0x2e9   : > { %v1529_v30 = vadd.f32 1e-05, %v1513_v13  ;;  %v1286_v43 = vadd.f32 %v1242_v42, %v1190_v39  ;;  %v1195_v39 = vmul.f32 %v2021_v62, %v1179_v50  ;;  %v1594_v50 = vld [vmem:[#allocation2 + $0x8] sm:$0xff] }
 0x2eb   : > { %2022 = vlog2.f32 %v1529_v30  ;;  %1303 = vst.msk [vmem:[#allocation3 + $0x8] sm:$0xff] %vm3434_vm13, %v1286_v43  ;;  %vm3465_vm13 = vmmov %vm3458_vm0 }
 0x2ec   : > { %v1269_v28 = vpop.xlane.xlu1 %1268  ;;  %2024 = vpow2.f32 %v935_v27 }
 0x2ed   : > { %v1295_v10 = vadd.f32 %v1269_v28, %v1199_v8  ;;  %2026 = vpow2.f32 %v957_v57  ;;  %v3450_v28 = vld [vmem:[#allocation22_spill] sm:$0xff] }
 0x2ee   : > { %2028 = vrcp.f32 %v1657_v34  ;;  %v3452_v34 = vsub.f32 %v3450_v28, %v3451_v33  ;;  %v3215_v33 = vld [vmem:[%s3138_s27 + $0x18] sm:$0xff] }
 0x2ef   : > { %1312 = vst.msk [vmem:[#allocation3 + $0x50] sm:$0xff] %vm3438_vm6, %v1295_v10  ;;  %2030 = vpow2.f32 %v951_v16  ;;  %v1184_v16 = vld [vmem:[#allocation3 + $0x58] sm:$0xff]  ;;  %vm3466_vm6 = vmmov %vm3458_vm0 }
 0x2f0   : > { %v1251_v24 = vpop.xlane.xlu1 %1250  ;;  %v943_v10 = vmul.f32 1.442695, %v3452_v34 }
 0x2f1   : > { %v1289_v63 = vadd.f32 %v1251_v24, %v1193_v46  ;;  %v3454_v46 = vld [vmem:[#allocation27_spill] sm:$0xff] }
 0x2f2   : > { %v1514_v38 = vld [vmem:[#allocation3 + $0x8] sm:$0xff]  ;;  %v3455_v18 = vsub.f32 %v3453_v26, %v3454_v46 }
 0x2f3   : > { %v1530_v51 = vadd.f32 1e-05, %v1514_v38  ;;  %1306 = vst.msk [vmem:[#allocation3 + $0x20] sm:$0xff] %vm3442_vm12, %v1289_v63  ;;  %vm3467_vm12 = vmmov %vm3458_vm0 }
 0x2f4   : > { %v1266_v49 = vpop.xlane.xlu0 %1265  ;;  %v1275_v1 = vpop.xlane.xlu1 %1274  ;;  %v959_v24 = vmul.f32 1.442695, %v3455_v18 }
 0x2f5   : > { %v2023_v45 = vpop.eup %2022  ;;  %2032 = vlog2.f32 %v1530_v51  ;;  %v1294_v60 = vadd.f32 %v1266_v49, %v1198_v55  ;;  %v1297_v54 = vadd.f32 %v1275_v1, %v1201_v47  ;;  %v3193_v51 = vld [vmem:[%s3138_s27 + $0x50] sm:$0xff]  ;;  %v1178_v1 = vld [vmem:[#allocation3 + $0x28] sm:$0xff] }
 0x2f6   : > { %2034 = vpow2.f32 %v939_v41  ;;  %v1546_v52 = vmul.f32 0.6931472, %v2023_v45  ;;  %v1523_v35 = vld [vmem:[#allocation3 + $0x50] sm:$0xff]  ;;  %v2025_v12 = vpop.eup %2024 }
 0x2f7   : > { %v1539_v14 = vadd.f32 1e-05, %v1523_v35  ;;  %1311 = vst.msk [vmem:[#allocation3 + $0x48] sm:$0xff] %vm3446_vm11, %v1294_v60  ;;  %v2027_v31 = vpop.eup %2026  ;;  %2036 = vlog2.f32 %v1537_v11  ;;  %v1192_v57 = vmul.f32 %v2025_v12, %v1176_v19  ;;  %v3197_v45 = vld [vmem:[%s3138_s27 + $0x10] sm:$0xff]  ;;  %vm3468_vm11 = vmmov %vm3458_vm0 }
 0x2f8   : > { %1314 = vst.msk [vmem:[#allocation3 + $0x60] sm:$0xff] %vm3447_vm9, %v1297_v54  ;;  %v1609_v13 = vadd.f32 %v1593_v40, %v1546_v52  ;;  %v1245_v42 = vpop.xlane.xlu0 %1244  ;;  %v1257_v29 = vpop.xlane.xlu1 %1256  ;;  %2038 = vpow2.f32 %v955_v3  ;;  %v1203_v8 = vmul.f32 %v2027_v31, %v1187_v21  ;;  %v1358_v52 = vld [vmem:[#allocation4 + $0x40] sm:$0xff]  ;;  %v1186_v21 = vld [vmem:[#allocation3 + $0x68] sm:$0xff]  ;;  %vm3469_vm9 = vmmov %vm3458_vm0 }
 0x2f9   : > { %v1287_v25 = vadd.f32 %v1245_v42, %v1191_v37  ;;  %v1291_v27 = vadd.f32 %v1257_v29, %v1195_v39  ;;  %2040 = vrcp.f32 %v1658_v58  ;;  %v2029_v32 = vpop.eup %2028  ;;  %v1667_v58 = vadd.f32 1e-05, %v3193_v51  ;;  %v3208_v39 = vld [vmem:[%s3138_s27 + $0x60] sm:$0xff] }
 0x2fa   : > { %v1625_v30 = vmul.f32 %v1609_v13, %v3147_v48  ;;  %v1517_v43 = vld [vmem:[#allocation3 + $0x20] sm:$0xff]  ;;  %2042 = vlog2.f32 %v1539_v14  ;;  %v2031_v44 = vpop.eup %2030  ;;  %v3204_v14 = vld [vmem:[%s3138_s27 + $0x30] sm:$0xff]  ;;  %v1659_v42 = vadd.f32 1e-05, %v3197_v45 }
 0x2fb   : > { %v1533_v59 = vadd.f32 1e-05, %v1517_v43  ;;  %1304 = vst.msk [vmem:[#allocation3 + $0x10] sm:$0xff] %vm3448_vm2, %v1287_v25  ;;  %v3175_v48 = vld [vmem:[%s3138_s27 + $0x20] sm:$0xff]  ;;  %v1200_v38 = vmul.f32 %v2031_v44, %v1184_v16  ;;  %v1669_v44 = vadd.f32 1e-05, %v3208_v39  ;;  %vm3470_vm2 = vmmov %vm3458_vm0 }
 0x2fc   : > { %1308 = vst.msk [vmem:[#allocation3 + $0x30] sm:$0xff] %vm3449_vm1, %v1291_v27  ;;  %v1641_v4 = vsub.f32 %v1577_v17, %v1625_v30  ;;  %v1248_v22 = vpop.xlane.xlu0 %1247  ;;  %v1281_v20 = vpop.xlane.xlu1 %1280  ;;  %v1661_v36 = vadd.f32 1e-05, %v3175_v48  ;;  %v1578_v27 = vld [vmem:[#allocation4 + $0x8] sm:$0xff]  ;;  %v1360_v17 = vld [vmem:[#allocation4 + $0x50] sm:$0xff]  ;;  %vm3471_vm1 = vmmov %vm3458_vm0 }
 0x2fd   : > { %2044 = vlog2.f32 %v1533_v59  ;;  %v1288_v53 = vadd.f32 %v1248_v22, %v1192_v57  ;;  %v1299_v15 = vadd.f32 %v1281_v20, %v1203_v8  ;;  %v1601_v22 = vld [vmem:[#allocation2 + $0x40] sm:$0xff] }
 0x2fe   : > { %v1674_v5 = vmul.f32 %v2029_v32, %v1641_v4  ;;  %2046 = vpow2.f32 %v943_v10 }
 0x2ff   : > { %v1525_v63 = vld [vmem:[#allocation3 + $0x60] sm:$0xff]  ;;  %v2033_v61 = vpop.eup %2032  ;;  %1305 = vst.msk [vmem:[#allocation3 + $0x18] sm:$0xff] %vm3456_vm10, %v1288_v53  ;;  %2048 = vpow2.f32 %v959_v24  ;;  %v3220_v24 = vld [vmem:[%s3138_s27 + $0x70] sm:$0xff]  ;;  %vm3472_vm10 = vmmov %vm3458_vm0 }
 0x300   : > { %v1541_v41 = vadd.f32 1e-05, %v1525_v63  ;;  %1316 = vst.msk [vmem:[#allocation3 + $0x70] sm:$0xff] %vm3457_vm4, %v1299_v15  ;;  %v2035_v55 = vpop.eup %2034  ;;  %v1705_v47 = vmul.f32 -1.0, %v1674_v5  ;;  %v1548_v62 = vmul.f32 0.6931472, %v2033_v61  ;;  %v1272_v11 = vpop.xlane.xlu0 %1271  ;;  %vm3473_vm4 = vmmov %vm3458_vm0 }
 0x301   : > { %v1418_v49 = vpop.xlane.xlu1 %1417  ;;  %v1296_v7 = vadd.f32 %v1272_v11, %v1200_v38  ;;  %v2037_v0 = vpop.eup %2036  ;;  %v1194_v37 = vmul.f32 %v2035_v55, %v1178_v1  ;;  %v1597_v53 = vld [vmem:[#allocation2 + $0x20] sm:$0xff]  ;;  %v1180_v11 = vld [vmem:[#allocation3 + $0x38] sm:$0xff] }
 0x302   : > { %v1452_v9 = vadd.f32 %v1418_v49, %v1356_v56  ;;  %1721 = vst.msk [vmem:[%s3184_s30] sm:$0xff] %vm3458_vm0, %v1705_v47  ;;  %v1610_v3 = vadd.f32 %v1594_v50, %v1548_v62  ;;  %2050 = vlog2.f32 %v1541_v41  ;;  %v1515_v60 = vld [vmem:[#allocation3 + $0x10] sm:$0xff]  ;;  %v2039_v35 = vpop.eup %2038  ;;  %v1562_v30 = vmul.f32 0.6931472, %v2037_v0  ;;  %v1362_v38 = vld [vmem:[#allocation4 + $0x60] sm:$0xff] }
 0x303   : > { %v1519_v54 = vld [vmem:[#allocation3 + $0x30] sm:$0xff]  ;;  %2052 = vrcp.f32 %v1661_v36  ;;  %v1531_v12 = vadd.f32 1e-05, %v1515_v60  ;;  %1313 = vst.msk [vmem:[#allocation3 + $0x58] sm:$0xff] %vm3459_vm5, %v1296_v7  ;;  %v2041_v31 = vpop.eup %2040  ;;  %v1202_v4 = vmul.f32 %v2039_v35, %v1186_v21  ;;  %v1660_v41 = vadd.f32 1e-05, %v3215_v33  ;;  %vm3474_vm5 = vmmov %vm3458_vm0 }
 0x304   : > { %v1535_v40 = vadd.f32 1e-05, %v1519_v54  ;;  %1468 = vst.msk [vmem:[#allocation4 + $0x30] sm:$0xff] %vm3460_vm14, %v1452_v9  ;;  %v1626_v13 = vmul.f32 %v1610_v3, %v3159_v23  ;;  %v1254_v29 = vpop.xlane.xlu0 %1253  ;;  %2054 = vrcp.f32 %v1665_v2  ;;  %v2043_v25 = vpop.eup %2042  ;;  %v1663_v23 = vadd.f32 1e-05, %v3204_v14  ;;  %v1603_v47 = vld [vmem:[#allocation2 + $0x50] sm:$0xff]  ;;  %vm3475_vm14 = vmmov %vm3458_vm0 }
 0x305   : > { %v1424_v19 = vpop.xlane.xlu1 %1423  ;;  %2056 = vlog2.f32 %v1531_v12  ;;  %v1290_v43 = vadd.f32 %v1254_v29, %v1194_v37  ;;  %v1566_v16 = vmul.f32 0.6931472, %v2043_v25  ;;  %v1617_v15 = vadd.f32 %v1601_v22, %v1562_v30  ;;  %v3232_v2 = vld [vmem:[%s3138_s27 + $0x28] sm:$0xff]  ;;  %v1581_v0 = vld [vmem:[#allocation4 + $0x20] sm:$0xff] }
 0x306   : > { %v1454_v32 = vadd.f32 %v1424_v19, %v1358_v52  ;;  %v1642_v59 = vsub.f32 %v1578_v27, %v1626_v13  ;;  %2058 = vlog2.f32 %v1535_v40  ;;  %v1516_v57 = vld [vmem:[#allocation3 + $0x18] sm:$0xff]  ;;  %v1671_v62 = vadd.f32 1e-05, %v3220_v24  ;;  %v1522_v3 = vld [vmem:[#allocation3 + $0x48] sm:$0xff]  ;;  %v1364_v19 = vld [vmem:[#allocation4 + $0x70] sm:$0xff] }
 0x307   : > { %v1527_v8 = vld [vmem:[#allocation3 + $0x70] sm:$0xff]  ;;  %v2045_v28 = vpop.eup %2044  ;;  %v1532_v34 = vadd.f32 1e-05, %v1516_v57  ;;  %1307 = vst.msk [vmem:[#allocation3 + $0x28] sm:$0xff] %vm3461_vm8, %v1290_v43  ;;  %2060 = vrcp.f32 %v1667_v58  ;;  %v1619_v50 = vadd.f32 %v1603_v47, %v1566_v16  ;;  %v1633_v54 = vmul.f32 %v1617_v15, %v3190_v6  ;;  %v1605_v25 = vld [vmem:[#allocation2 + $0x60] sm:$0xff]  ;;  %vm3476_vm8 = vmmov %vm3458_vm0 }
 0x308   : > { %v1543_v10 = vadd.f32 1e-05, %v1527_v8  ;;  %1470 = vst.msk [vmem:[#allocation4 + $0x40] sm:$0xff] %vm3462_vm7, %v1454_v32  ;;  %v1676_v20 = vmul.f32 %v2041_v31, %v1642_v59  ;;  %v1554_v26 = vmul.f32 0.6931472, %v2045_v28  ;;  %2062 = vrcp.f32 %v1659_v42  ;;  %v1278_v46 = vpop.xlane.xlu0 %1277  ;;  %v2047_v56 = vpop.eup %2046  ;;  %v1595_v59 = vld [vmem:[#allocation2 + $0x10] sm:$0xff]  ;;  %vm3477_vm7 = vmmov %vm3458_vm0 }
 0x309   : > { %v1430_v18 = vpop.xlane.xlu1 %1429  ;;  %2064 = vlog2.f32 %v1532_v34  ;;  %v1298_v5 = vadd.f32 %v1278_v46, %v1202_v4  ;;  %v3223_v55 = vpop.eup %2048  ;;  %v1196_v37 = vmul.f32 %v2047_v56, %v1180_v11  ;;  %v1662_v13 = vadd.f32 1e-05, %v3232_v2  ;;  %v1599_v34 = vld [vmem:[#allocation2 + $0x30] sm:$0xff] }
 0x30a   : > { %v1456_v63 = vadd.f32 %v1430_v18, %v1360_v17  ;;  %v1706_v61 = vmul.f32 -1.0, %v1676_v20  ;;  %v1613_v36 = vadd.f32 %v1597_v53, %v1554_v26  ;;  %2066 = vlog2.f32 %v1543_v10 }
 0x30b   : > { %2068 = vrcp.f32 %v1663_v23  ;;  %1315 = vst.msk [vmem:[#allocation3 + $0x68] sm:$0xff] %vm3463_vm3, %v1298_v5  ;;  %v1538_v27 = vadd.f32 1e-05, %v1522_v3  ;;  %v1635_v43 = vmul.f32 %v1619_v50, %v3193_v51  ;;  %vm3478_vm3 = vmmov %vm3458_vm0 }
 0x30c   : > { %1472 = vst.msk [vmem:[#allocation4 + $0x50] sm:$0xff] %vm3464_vm15, %v1456_v63  ;;  %v2051_v49 = vpop.eup %2050  ;;  %v1629_v1 = vmul.f32 %v1613_v36, %v3175_v48  ;;  %2070 = vrcp.f32 %v1669_v44  ;;  %v1524_v48 = vld [vmem:[#allocation3 + $0x58] sm:$0xff]  ;;  %vm3479_vm15 = vmmov %vm3458_vm0 }
 0x30d   : > { %1722 = vst.msk [vmem:[%s3184_s30 + $0x8] sm:$0xff] %vm3465_vm13, %v1706_v61  ;;  %v1436_v7 = vpop.xlane.xlu1 %1435  ;;  %v2053_v9 = vpop.eup %2052  ;;  %v1570_v60 = vmul.f32 0.6931472, %v2051_v49  ;;  %2072 = vrcp.f32 %v1660_v41  ;;  %v1188_v44 = vld [vmem:[#allocation3 + $0x78] sm:$0xff]  ;;  %v1540_v22 = vadd.f32 1e-05, %v1524_v48  ;;  %vm3480_vm13 = vmmov %vm3458_vm0 }
 0x30e   : > { %v1458_v52 = vadd.f32 %v1436_v7, %v1362_v38  ;;  %v2055_v58 = vpop.eup %2054  ;;  %v1645_v35 = vsub.f32 %v1581_v0, %v1629_v1  ;;  %v1518_v12 = vld [vmem:[#allocation3 + $0x28] sm:$0xff]  ;;  %2074 = vrcp.f32 %v1671_v62  ;;  %v1204_v56 = vmul.f32 %v3223_v55, %v1188_v44  ;;  %v1596_v36 = vld [vmem:[#allocation2 + $0x18] sm:$0xff]  ;;  %v1579_v41 = vld [vmem:[#allocation4 + $0x10] sm:$0xff] }
 0x30f   : > { %v1585_v40 = vld [vmem:[#allocation4 + $0x40] sm:$0xff]  ;;  %v2057_v31 = vpop.eup %2056  ;;  %v1534_v42 = vadd.f32 1e-05, %v1518_v12  ;;  %v1621_v23 = vadd.f32 %v1605_v25, %v1570_v60  ;;  %v3253_v25 = vld [vmem:[%s3138_s27 + $0x48] sm:$0xff] }
 0x310   : > { %v1649_v29 = vsub.f32 %v1585_v40, %v1633_v54  ;;  %1474 = vst.msk [vmem:[#allocation4 + $0x60] sm:$0xff] %vm3466_vm6, %v1458_v52  ;;  %v2059_v21 = vpop.eup %2058  ;;  %v1682_v6 = vmul.f32 %v2053_v9, %v1645_v35  ;;  %v1550_v30 = vmul.f32 0.6931472, %v2057_v31  ;;  %v1583_v9 = vld [vmem:[#allocation4 + $0x30] sm:$0xff]  ;;  %v1580_v31 = vld [vmem:[#allocation4 + $0x18] sm:$0xff]  ;;  %vm3481_vm6 = vmmov %vm3458_vm0 }
 0x311   : > { %v1442_v32 = vpop.xlane.xlu1 %1441  ;;  %v2061_v17 = vpop.eup %2060  ;;  %v1558_v57 = vmul.f32 0.6931472, %v2059_v21  ;;  %2076 = vlog2.f32 %v1534_v42  ;;  %v1637_v49 = vmul.f32 %v1621_v23, %v3208_v39  ;;  %v1357_v21 = vld [vmem:[#allocation4 + $0x38] sm:$0xff] }
 0x312   : > { %v1690_v8 = vmul.f32 %v2055_v58, %v1649_v29  ;;  %v2063_v28 = vpop.eup %2062  ;;  %v1709_v10 = vmul.f32 -1.0, %v1682_v6  ;;  %v1611_v4 = vadd.f32 %v1595_v59, %v1550_v30  ;;  %v1460_v16 = vadd.f32 %v1442_v32, %v1364_v19  ;;  %v1526_v62 = vld [vmem:[#allocation3 + $0x68] sm:$0xff] }
 0x313   : > { %v1587_v20 = vld [vmem:[#allocation4 + $0x50] sm:$0xff]  ;;  %v2065_v26 = vpop.eup %2064  ;;  %v1615_v46 = vadd.f32 %v1599_v34, %v1558_v57  ;;  %2078 = vrcp.f32 %v1662_v13  ;;  %v1542_v12 = vadd.f32 1e-05, %v1526_v62  ;;  %v1602_v62 = vld [vmem:[#allocation2 + $0x48] sm:$0xff] }
 0x314   : > { %v1713_v51 = vmul.f32 -1.0, %v1690_v8  ;;  %v1651_v18 = vsub.f32 %v1587_v20, %v1635_v43  ;;  %v2067_v53 = vpop.eup %2066  ;;  %1725 = vst.msk [vmem:[%s3184_s30 + $0x20] sm:$0xff] %vm3467_vm12, %v1709_v10  ;;  %2080 = vlog2.f32 %v1538_v27  ;;  %v1627_v15 = vmul.f32 %v1611_v4, %v3197_v45  ;;  %v1260_v63 = vpop.xlane.xlu0 %1259  ;;  %v1607_v45 = vld [vmem:[#allocation2 + $0x70] sm:$0xff]  ;;  %v1598_v8 = vld [vmem:[#allocation2 + $0x28] sm:$0xff]  ;;  %v1508_v20 = vld [vmem:[%s3138_s27 + $0x58] sm:$0xff] }
 0x315   : > { %v1552_v5 = vmul.f32 0.6931472, %v2065_v26  ;;  %1476 = vst.msk [vmem:[#allocation4 + $0x70] sm:$0xff] %vm3468_vm11, %v1460_v16  ;;  %v2069_v61 = vpop.eup %2068  ;;  %v1574_v38 = vmul.f32 0.6931472, %v2067_v53  ;;  %v1631_v47 = vmul.f32 %v1615_v46, %v3204_v14  ;;  %2082 = vlog2.f32 %v1540_v22  ;;  %v1359_v4 = vld [vmem:[#allocation4 + $0x48] sm:$0xff]  ;;  %vm3482_vm12 = vmmov %vm3458_vm0 }
 0x316   : > { %1729 = vst.msk [vmem:[%s3184_s30 + $0x40] sm:$0xff] %vm3469_vm9, %v1713_v51  ;;  %v1694_v11 = vmul.f32 %v2061_v17, %v1651_v18  ;;  %v2071_v1 = vpop.eup %2070  ;;  %v1643_v50 = vsub.f32 %v1579_v41, %v1627_v15  ;;  %v1292_v0 = vadd.f32 %v1260_v63, %v1196_v37  ;;  %v1666_v43 = vadd.f32 1e-05, %v3253_v25  ;;  %v3269_v18 = vld [vmem:[%s3138_s27 + $0x38] sm:$0xff]  ;;  %vm3483_vm11 = vmmov %vm3458_vm0 }
 0x317   : > { %v1612_v7 = vadd.f32 %v1596_v36, %v1552_v5  ;;  %v1589_v55 = vld [vmem:[#allocation4 + $0x60] sm:$0xff]  ;;  %v1647_v3 = vsub.f32 %v1583_v9, %v1631_v47  ;;  %v1623_v52 = vadd.f32 %v1607_v45, %v1574_v38  ;;  %v2073_v14 = vpop.eup %2072  ;;  %2084 = vlog2.f32 %v1542_v12  ;;  %v1582_v5 = vld [vmem:[#allocation4 + $0x28] sm:$0xff]  ;;  %v1361_v41 = vld [vmem:[#allocation4 + $0x58] sm:$0xff] }
 0x318   : > { %v1715_v60 = vmul.f32 -1.0, %v1694_v11  ;;  %v1653_v54 = vsub.f32 %v1589_v55, %v1637_v49  ;;  %v1678_v58 = vmul.f32 %v2063_v28, %v1643_v50  ;;  %1309 = vst.msk [vmem:[#allocation3 + $0x38] sm:$0xff] %vm3470_vm2, %v1292_v0  ;;  %v1284_v39 = vpop.xlane.xlu0 %1283  ;;  %v2075_v40 = vpop.eup %2074  ;;  %2086 = vrcp.f32 %v1666_v43  ;;  %v1510_v47 = vld [vmem:[%s3138_s27 + $0x68] sm:$0xff]  ;;  %v1512_v9 = vld [vmem:[%s3138_s27 + $0x78] sm:$0xff]  ;;  %vm3484_vm9 = vmmov %vm3458_vm0 }
 0x319   : > { %v1628_v35 = vmul.f32 %v1612_v7, %v3215_v33  ;;  %v1686_v48 = vmul.f32 %v2069_v61, %v1647_v3  ;;  %v1639_v13 = vmul.f32 %v1623_v52, %v3220_v24  ;;  %v1300_v42 = vadd.f32 %v1284_v39, %v1204_v56  ;;  %v1363_v3 = vld [vmem:[#allocation4 + $0x68] sm:$0xff]  ;;  %vm3485_vm2 = vmmov %vm3458_vm0 }
 0x31a   : > { %1731 = vst.msk [vmem:[%s3184_s30 + $0x50] sm:$0xff] %vm3471_vm1, %v1715_v60  ;;  %v1698_v37 = vmul.f32 %v2071_v1, %v1653_v54  ;;  %v1707_v29 = vmul.f32 -1.0, %v1678_v58  ;;  %v1668_v15 = vadd.f32 1e-05, %v1508_v20  ;;  %v1670_v45 = vadd.f32 1e-05, %v1510_v47  ;;  %vm3486_vm1 = vmmov %vm3458_vm0 }
 0x31b   : > { %v1644_v19 = vsub.f32 %v1580_v31, %v1628_v35  ;;  %v2077_v33 = vpop.eup %2076  ;;  %v1711_v6 = vmul.f32 -1.0, %v1686_v48  ;;  %1317 = vst.msk [vmem:[#allocation3 + $0x78] sm:$0xff] %vm3472_vm10, %v1300_v42  ;;  %v1604_v60 = vld [vmem:[#allocation2 + $0x58] sm:$0xff]  ;;  %vm3487_vm10 = vmmov %vm3458_vm0 }
 0x31c   : > { %v1717_v27 = vmul.f32 -1.0, %v1698_v37  ;;  %v1591_v30 = vld [vmem:[#allocation4 + $0x70] sm:$0xff]  ;;  %1723 = vst.msk [vmem:[%s3184_s30 + $0x10] sm:$0xff] %vm3473_vm4, %v1707_v29  ;;  %v1556_v24 = vmul.f32 0.6931472, %v2077_v33  ;;  %v1421_v59 = vpop.xlane.xlu0 %1420  ;;  %v1365_v31 = vld [vmem:[#allocation4 + $0x78] sm:$0xff] }
 0x31d   : > { %v1680_v32 = vmul.f32 %v2073_v14, %v1644_v19  ;;  %v1655_v17 = vsub.f32 %v1591_v30, %v1639_v13  ;;  %v2079_v57 = vpop.eup %2078  ;;  %1727 = vst.msk [vmem:[%s3184_s30 + $0x30] sm:$0xff] %vm3458_vm0, %v1711_v6  ;;  %v1453_v23 = vadd.f32 %v1421_v59, %v1357_v21  ;;  %v1672_v14 = vadd.f32 1e-05, %v1512_v9  ;;  %v1606_v13 = vld [vmem:[#allocation2 + $0x68] sm:$0xff]  ;;  %v1600_v30 = vld [vmem:[#allocation2 + $0x38] sm:$0xff] }
 0x31e   : > { %1733 = vst.msk [vmem:[%s3184_s30 + $0x60] sm:$0xff] %vm3474_vm5, %v1717_v27  ;;  %v2081_v44 = vpop.eup %2080  ;;  %v1614_v34 = vadd.f32 %v1598_v8, %v1556_v24  ;;  %v1608_v8 = vld [vmem:[#allocation2 + $0x78] sm:$0xff] }
 0x31f   : > { %v1708_v28 = vmul.f32 -1.0, %v1680_v32  ;;  %v1702_v10 = vmul.f32 %v2075_v40, %v1655_v17  ;;  %v1520_v22 = vld [vmem:[#allocation3 + $0x38] sm:$0xff]  ;;  %1469 = vst.msk [vmem:[#allocation4 + $0x38] sm:$0xff] %vm3475_vm14, %v1453_v23  ;;  %v2083_v16 = vpop.eup %2082  ;;  %v1564_v63 = vmul.f32 0.6931472, %v2081_v44 }
 0x320   : > { %v1630_v26 = vmul.f32 %v1614_v34, %v3232_v2  ;;  %v1536_v51 = vadd.f32 1e-05, %v1520_v22  ;;  %v1427_v53 = vpop.xlane.xlu0 %1426  ;;  %v1664_v2 = vadd.f32 1e-05, %v3269_v18  ;;  %v1568_v11 = vmul.f32 0.6931472, %v2083_v16 }
 0x321   : > { %1724 = vst.msk [vmem:[%s3184_s30 + $0x18] sm:$0xff] %vm3476_vm8, %v1708_v28  ;;  %v1719_v46 = vmul.f32 -1.0, %v1702_v10  ;;  %v1455_v56 = vadd.f32 %v1427_v53, %v1359_v4  ;;  %v1618_v50 = vadd.f32 %v1602_v62, %v1564_v63  ;;  %v2085_v55 = vpop.eup %2084 }
 0x322   : > { %v1646_v61 = vsub.f32 %v1582_v5, %v1630_v26  ;;  %2088 = vlog2.f32 %v1536_v51  ;;  %v1528_v36 = vld [vmem:[#allocation3 + $0x78] sm:$0xff]  ;;  %v1620_v54 = vadd.f32 %v1604_v60, %v1568_v11  ;;  %v2087_v58 = vpop.eup %2086  ;;  %v1572_v35 = vmul.f32 0.6931472, %v2085_v55 }
 0x323   : > { %1735 = vst.msk [vmem:[%s3184_s30 + $0x70] sm:$0xff] %vm3477_vm7, %v1719_v46  ;;  %v1544_v38 = vadd.f32 1e-05, %v1528_v36  ;;  %2090 = vrcp.f32 %v1668_v15  ;;  %v1634_v12 = vmul.f32 %v1618_v50, %v3253_v25 }
 0x324   : > { %1471 = vst.msk [vmem:[#allocation4 + $0x48] sm:$0xff] %vm3478_vm3, %v1455_v56  ;;  %v1684_v49 = vmul.f32 %v2079_v57, %v1646_v61  ;;  %v1433_v1 = vpop.xlane.xlu0 %1432  ;;  %v1636_v42 = vmul.f32 %v1620_v54, %v1508_v20  ;;  %v1622_v33 = vadd.f32 %v1606_v13, %v1572_v35 }
 0x325   : > { %2092 = vlog2.f32 %v1544_v38  ;;  %v1457_v7 = vadd.f32 %v1433_v1, %v1361_v41 }
 0x326   : > { %v1710_v0 = vmul.f32 -1.0, %v1684_v49  ;;  %2094 = vrcp.f32 %v1664_v2  ;;  %v1638_v28 = vmul.f32 %v1622_v33, %v1510_v47  ;;  %v1584_v10 = vld [vmem:[#allocation4 + $0x38] sm:$0xff] }
 0x327   : > { %1473 = vst.msk [vmem:[#allocation4 + $0x58] sm:$0xff] %vm3479_vm15, %v1457_v7  ;;  %2096 = vrcp.f32 %v1670_v45 }
 0x328   : > { %1726 = vst.msk [vmem:[%s3184_s30 + $0x28] sm:$0xff] %vm3480_vm13, %v1710_v0  ;;  %v1439_v52 = vpop.xlane.xlu0 %1438  ;;  %2098 = vrcp.f32 %v1672_v14 }
 0x329   : > { %v1459_v39 = vadd.f32 %v1439_v52, %v1363_v3 }
 0x32b   : > { %v1586_v40 = vld [vmem:[#allocation4 + $0x48] sm:$0xff]  ;;  %1475 = vst.msk [vmem:[#allocation4 + $0x68] sm:$0xff] %vm3481_vm6, %v1459_v39 }
 0x32c   : > { %v1650_v48 = vsub.f32 %v1586_v40, %v1634_v12  ;;  %v2089_v37 = vpop.eup %2088  ;;  %v1445_v29 = vpop.xlane.xlu0 %1444 }
 0x32d   : > { %v1560_v19 = vmul.f32 0.6931472, %v2089_v37  ;;  %v1461_v6 = vadd.f32 %v1445_v29, %v1365_v31  ;;  %v2091_v27 = vpop.eup %2090 }
 0x32e   : > { %v1692_v21 = vmul.f32 %v2087_v58, %v1650_v48  ;;  %v1588_v43 = vld [vmem:[#allocation4 + $0x58] sm:$0xff] }
 0x32f   : > { %v2093_v25 = vpop.eup %2092  ;;  %v1616_v32 = vadd.f32 %v1600_v30, %v1560_v19  ;;  %v1652_v17 = vsub.f32 %v1588_v43, %v1636_v42  ;;  %1477 = vst.msk [vmem:[#allocation4 + $0x78] sm:$0xff] %vm3482_vm12, %v1461_v6 }
 0x330   : > { %v1714_v24 = vmul.f32 -1.0, %v1692_v21  ;;  %v1576_v59 = vmul.f32 0.6931472, %v2093_v25  ;;  %v2095_v57 = vpop.eup %2094 }
 0x331   : > { %v1632_v23 = vmul.f32 %v1616_v32, %v3269_v18  ;;  %v1696_v44 = vmul.f32 %v2091_v27, %v1652_v17  ;;  %v2097_v34 = vpop.eup %2096 }
 0x332   : > { %1730 = vst.msk [vmem:[%s3184_s30 + $0x48] sm:$0xff] %vm3483_vm11, %v1714_v24  ;;  %v1590_v4 = vld [vmem:[#allocation4 + $0x68] sm:$0xff]  ;;  %v1624_v22 = vadd.f32 %v1608_v8, %v1576_v59  ;;  %v2099_v18 = vpop.eup %2098 }
 0x333   : > { %v1648_v20 = vsub.f32 %v1584_v10, %v1632_v23  ;;  %v1716_v16 = vmul.f32 -1.0, %v1696_v44  ;;  %v1654_v26 = vsub.f32 %v1590_v4, %v1638_v28 }
 0x334   : > { %v1640_v46 = vmul.f32 %v1624_v22, %v1512_v9 }
 0x335   : > { %v1688_v51 = vmul.f32 %v2095_v57, %v1648_v20  ;;  %1732 = vst.msk [vmem:[%s3184_s30 + $0x58] sm:$0xff] %vm3484_vm9, %v1716_v16  ;;  %v1700_v53 = vmul.f32 %v2097_v34, %v1654_v26 }
 0x336   : > { %v1592_v15 = vld [vmem:[#allocation4 + $0x78] sm:$0xff] }
 0x337   : > { %v1712_v5 = vmul.f32 -1.0, %v1688_v51  ;;  %v1718_v63 = vmul.f32 -1.0, %v1700_v53  ;;  %v1656_v56 = vsub.f32 %v1592_v15, %v1640_v46 }
 0x339   : > { %1728 = vst.msk [vmem:[%s3184_s30 + $0x38] sm:$0xff] %vm3485_vm2, %v1712_v5  ;;  %v1704_v61 = vmul.f32 %v2099_v18, %v1656_v56 }
 0x33a   : > { %1734 = vst.msk [vmem:[%s3184_s30 + $0x68] sm:$0xff] %vm3486_vm1, %v1718_v63 }
 0x33b   : > { %v1720_v36 = vmul.f32 -1.0, %v1704_v61 }
 0x33d   : > { %1736 = vst.msk [vmem:[%s3184_s30 + $0x78] sm:$0xff] %vm3487_vm10, %v1720_v36 }
 0x33e PF: > { %s15_s20 = sadd.s32 1, %s2122_s20   ;;  %s3488_s18 = smov %s2118_s19 }
 0x33f   : > { %p12_p5 = scmp.ge.s32.totalorder %s15_s20, 4   ;;  %s3489_s19 = smov %s3491_s21 }
 0x341   :  { %14 = sbr.rel (!%p12_p5) target bundleno = 2 (0x2), region = 90 }

</bundles_post_ra>
